<compile_context>
chip_gen: v6e
topology: v6e:2x2x1
jax: 0.10.0
libtpu: 0.0.40
codegen_flags: <defaults>
</compile_context>

<pallas_src>
import functools
import math

import jax
import jax.numpy as jnp
from jax.experimental import pallas as pl
from jax.experimental.pallas import tpu as pltpu

HIDDEN = 768
NUM_CLASSES = 5
PADDED_CLASSES = 128   # lane-dense classifier head; real classes live in [:, :5]
SUB_SEQ = 128          # in-kernel compute sub-chunk along the sequence axis


def _classifier_kernel(cls_ref, x_ref, bias_ref, labels_ref,
                       wpool_ref, bpool_ref, wout_ref, bout_ref,
                       logits_ref, loss_ref,
                       m_sc, l_sc, acc_sc, *, compute_loss, sub_seq):
    """CLS-only attention (online softmax over S) -> pooler -> head -> CE."""
    s_idx = pl.program_id(1)
    n_s = pl.num_programs(1)

    @pl.when(s_idx == 0)
    def _init():
        m_sc[...] = jnp.full(m_sc.shape, -1e30, dtype=jnp.float32)
        l_sc[...] = jnp.zeros(l_sc.shape, dtype=jnp.float32)
        acc_sc[...] = jnp.zeros(acc_sc.shape, dtype=jnp.float32)

    # TODO(synk): the real `transformer_model` is an injected external module
    # (BERT-like); a single parameter-free CLS-attention layer stands in.
    cls = cls_ref[...]                              # (Bt, 1, H) bf16, invariant
    st = x_ref.shape[1]
    n_sub = st // sub_seq
    inv_sqrt_h = 1.0 / math.sqrt(HIDDEN)

    def _process(start):
        xs = x_ref[:, pl.ds(start, sub_seq), :]     # (Bt, sub, H) bf16
        bias = bias_ref[:, pl.ds(start, sub_seq)]   # (Bt, sub)    f32, 0 / -1e9

        # CLS scores on the MXU in the x @ cls^T form ('bkh,bqh->bkq'): the big
        # KV sub-tile keeps its contraction dim (H) on lanes -> no KV transpose;
        # only the tiny (1, H) CLS row gets re-laid-out.  N=1 wastes MXU width,
        # but the MXU now only carries one of the two matvecs.
        scores = jnp.einsum('bkh,bqh->bkq', xs, cls,
                            preferred_element_type=jnp.float32)   # (Bt, sub, 1)
        scores = scores * inv_sqrt_h + bias[:, :, None]

        # Online softmax over the sequence (sublane) axis.
        m_prev = m_sc[...]                                        # (Bt, 1, 1)
        m_new = jnp.maximum(m_prev, jnp.max(scores, axis=1, keepdims=True))
        alpha = jnp.exp(m_prev - m_new)
        p = jnp.exp(scores - m_new)                               # (Bt, sub, 1)
        l_sc[...] = alpha * l_sc[...] + jnp.sum(p, axis=1, keepdims=True)

        # Context accumulation on the VPU: broadcast p over the H lanes,
        # multiply, sublane-reduce over k.  Overlaps with the MXU scores push.
        ctx = jnp.sum(p * xs, axis=1, keepdims=True)              # (Bt, 1, H) f32
        acc_sc[...] = alpha * acc_sc[...] + ctx
        m_sc[...] = m_new

    if n_sub <= 1:
        _process(0)
    else:
        @pl.loop(0, n_sub)
        def _(j):
            _process(pl.multiple_of(j * sub_seq, sub_seq))

    @pl.when(s_idx == n_s - 1)
    def _finalize():
        # Exact reciprocal: finalize-only on Bt scalars, so it costs nothing.
        ctx = acc_sc[...] * pl.reciprocal(l_sc[...], approx=False)   # (Bt,1,H)
        cls_out = ctx[:, 0, :] + cls[:, 0, :].astype(jnp.float32)    # residual

        # BERT-style pooler: tanh(cls @ W_pool + b_pool), bf16 MXU / f32 acc.
        pooled = jnp.tanh(
            jnp.dot(cls_out.astype(jnp.bfloat16), wpool_ref[...],
                    preferred_element_type=jnp.float32) + bpool_ref[...])

        # Classification head: Linear(768, 5), lane-padded to 128 columns.
        logits = (jnp.dot(pooled.astype(jnp.bfloat16), wout_ref[...],
                          preferred_element_type=jnp.float32)
                  + bout_ref[...])                                   # (Bt, 128)
        logits_ref[...] = logits

        if compute_loss:
            bt = logits.shape[0]
            col = jax.lax.broadcasted_iota(jnp.int32, (bt, PADDED_CLASSES), 1)
            # Exclude padded columns from the logsumexp.
            logits_valid = jnp.where(col < NUM_CLASSES, logits,
                                     jnp.float32(-1e30))
            lmax = jnp.max(logits_valid, axis=-1, keepdims=True)
            lse = lmax + jnp.log(jnp.sum(jnp.exp(logits_valid - lmax),
                                         axis=-1, keepdims=True))
            labels = labels_ref[...]                                 # (Bt,1) i32
            onehot = (col == labels).astype(jnp.float32)
            picked = jnp.sum(onehot * logits, axis=-1, keepdims=True)
            loss_ref[...] = lse - picked                             # per-sample NLL
        else:
            loss_ref[...] = jnp.zeros(loss_ref.shape, dtype=jnp.float32)


def _vmem_capacity_bytes():
    try:
        info = pltpu.get_tpu_info()
        cap = int(getattr(info, "vmem_capacity_bytes", 0) or 0)
        if cap > 0:
            return cap
    except Exception:
        pass
    return 64 * 1024 * 1024        # conservative: v7x per-TensorCore VMEM


def _pick_tiles(B, S, vmem_cap):
    # Batch tile: 8 keeps per-sub-chunk f32 temporaries ~3 MiB and, for
    # B >= 16, guarantees >= 2 batch tiles so the "parallel" batch axis
    # shards across both v7x TensorCores.  On 128 MiB parts (v5e/v6e) a
    # 16-row tile is allowed when it still leaves >= 2 batch tiles.
    if B <= 8:
        bt = B
    elif B % 8 != 0:
        bt = B                                     # full dim is always legal
    else:
        bt = 8
        if vmem_cap >= 96 * 1024 * 1024 and B % 16 == 0 and B >= 32:
            bt = 16

    # Sequence tile (DMA granularity): largest multiple of 128 dividing S
    # whose double-buffered bf16 KV block stays within ~35% of physical VMEM.
    # Compute temporaries do not scale with St thanks to the SUB_SEQ loop.
    if S <= 128 or S % 128 != 0:
        st = S
    else:
        kv_budget = int(vmem_cap * 0.35)
        st = 128
        for cand in (2048, 1024, 768, 512, 384, 256, 128):
            if S % cand == 0 and bt * cand * HIDDEN * 2 * 2 <= kv_budget:
                st = cand
                break
    return bt, st


def _vmem_limit_bytes(bt, st, sub, vmem_cap):
    kv = bt * st * HIDDEN * 2 * 2                          # 2-buffered bf16 KV
    bias = bt * st * 4 * 2                                 # 2-buffered f32 bias
    consts = 2 * (HIDDEN * HIDDEN * 2                      # wpool (bf16)
                  + HIDDEN * PADDED_CLASSES * 2            # wout  (bf16)
                  + bt * HIDDEN * 2                        # cls   (bf16)
                  + (HIDDEN + PADDED_CLASSES) * 4          # biases
                  + bt * 128 * 4)                          # labels (lane-padded)
    outs = 2 * (bt * PADDED_CLASSES * 4 + bt * 128 * 4)
    scratch = bt * (HIDDEN + 2 * 128) * 4 * 8              # padded (Bt,1,*) scratch
    temps = 4 * bt * sub * HIDDEN * 4                      # f32 loop temporaries
    need = kv + bias + consts + outs + scratch + temps + (12 << 20)
    return max(32 * 1024 * 1024, min(need, int(vmem_cap * 0.9)))


@functools.partial(jax.jit, static_argnames=("compute_loss",))
def _classifier_head_call(cls_tok, embedded, mask_bias, labels,
                          wpool, bpool, wout, bout, *, compute_loss):
    B, S, H = embedded.shape
    vmem_cap = _vmem_capacity_bytes()
    Bt, St = _pick_tiles(B, S, vmem_cap)
    sub = SUB_SEQ if (St >= SUB_SEQ and St % SUB_SEQ == 0) else St
    grid = (B // Bt, S // St)

    kernel = functools.partial(_classifier_kernel,
                               compute_loss=compute_loss, sub_seq=sub)

    logits_pad, per_sample_loss = pl.pallas_call(
        kernel,
        grid_spec=pltpu.PrefetchScalarGridSpec(
            num_scalar_prefetch=0,
            grid=grid,
            in_specs=[
                pl.BlockSpec((Bt, 1, H), lambda b, s: (b, 0, 0)),        # CLS (bf16)
                pl.BlockSpec((Bt, St, H), lambda b, s: (b, s, 0)),       # KV tile (bf16)
                pl.BlockSpec((Bt, St), lambda b, s: (b, s)),             # additive mask bias
                pl.BlockSpec((Bt, 1), lambda b, s: (b, 0)),              # labels
                pl.BlockSpec((H, H), lambda b, s: (0, 0)),               # W_pool (bf16)
                pl.BlockSpec((1, H), lambda b, s: (0, 0)),               # b_pool
                pl.BlockSpec((H, PADDED_CLASSES), lambda b, s: (0, 0)),  # W_out (bf16, padded)
                pl.BlockSpec((1, PADDED_CLASSES), lambda b, s: (0, 0)),  # b_out (padded)
            ],
            out_specs=(
                pl.BlockSpec((Bt, PADDED_CLASSES), lambda b, s: (b, 0)),  # logits
                pl.BlockSpec((Bt, 1), lambda b, s: (b, 0)),               # per-sample loss
            ),
            scratch_shapes=[
                pltpu.VMEM((Bt, 1, 1), jnp.float32),   # running max
                pltpu.VMEM((Bt, 1, 1), jnp.float32),   # running denom
                pltpu.VMEM((Bt, 1, HIDDEN), jnp.float32),   # running context
            ],
        ),
        out_shape=(jax.ShapeDtypeStruct((B, PADDED_CLASSES), jnp.float32),
                   jax.ShapeDtypeStruct((B, 1), jnp.float32)),
        compiler_params=pltpu.CompilerParams(
            dimension_semantics=("parallel", "arbitrary"),
            vmem_limit_bytes=_vmem_limit_bytes(Bt, St, sub, vmem_cap)),
    )(cls_tok, embedded, mask_bias, labels, wpool, bpool, wout, bout)

    logits = logits_pad[:, :NUM_CLASSES]
    loss = jnp.mean(per_sample_loss)        # CrossEntropyLoss mean reduction
    return logits, loss


def init_params(vocab_size, max_seq, hidden=HIDDEN, num_classes=NUM_CLASSES):
    """Deterministic synthetic parameters (no checkpoint load)."""
    keys = jax.random.split(jax.random.PRNGKey(0), 6)
    scale = 0.02
    wout_raw = scale * jax.random.normal(keys[4], (hidden, num_classes),
                                         jnp.float32)
    # torch Linear(768, 5) weight stored transposed and lane-padded to 128.
    wout_pad = jnp.zeros((hidden, PADDED_CLASSES),
                         jnp.float32).at[:, :num_classes].set(wout_raw)
    return {
        "word_emb": scale * jax.random.normal(keys[0], (vocab_size, hidden),
                                              jnp.float32),
        "pos_emb": scale * jax.random.normal(keys[1], (max_seq, hidden),
                                             jnp.float32),
        "type_emb": scale * jax.random.normal(keys[2], (2, hidden),
                                              jnp.float32),
        # bf16 weights: one MXU pass per matmul, half the resident VMEM.
        "wpool": (scale * jax.random.normal(keys[3], (hidden, hidden),
                                            jnp.float32)).astype(jnp.bfloat16),
        "bpool": jnp.zeros((1, hidden), jnp.float32),
        "wout": wout_pad.astype(jnp.bfloat16),              # (768, 128) bf16
        "bout": jnp.zeros((1, PADDED_CLASSES), jnp.float32),
    }


def classifier_forward(params, input_ids, attention_mask, segment_id,
                       classification_labels=None):
    """Mirrors Classifier.forward: returns [logits] or [logits, loss]."""
    B, S = input_ids.shape
    # Embedding lookup is glue (gather); heavy math happens in the kernel.
    embedded = (params["word_emb"][input_ids]
                + params["pos_emb"][None, :S, :]
                + params["type_emb"][segment_id]).astype(jnp.bfloat16)
    cls_tok = embedded[:, :1, :]                     # (B, 1, H) CLS query
    # Additive attention bias precomputed once: 0 = keep, -1e9 = padding.
    mask_bias = (attention_mask.astype(jnp.float32) - 1.0) * 1e9

    compute_loss = classification_labels is not None
    if compute_loss:
        labels2 = classification_labels.reshape(B, 1).astype(jnp.int32)
    else:
        labels2 = jnp.zeros((B, 1), jnp.int32)       # dummy; epilogue compiled out

    logits, loss = _classifier_head_call(
        cls_tok, embedded, mask_bias, labels2,
        params["wpool"], params["bpool"], params["wout"], params["bout"],
        compute_loss=compute_loss)

    outputs = [logits]
    if compute_loss:
        outputs.append(loss)
    return outputs


if __name__ == "__main__":
    B, S, VOCAB = 2, 8, 100

    params = init_params(vocab_size=VOCAB, max_seq=S)

    key = jax.random.PRNGKey(0)
    k_ids, k_lbl = jax.random.split(key)
    input_ids = jax.random.randint(k_ids, (B, S), 0, VOCAB, dtype=jnp.int32)
    attention_mask = jnp.ones((B, S), jnp.int32).at[1, 6:].set(0)
    segment_id = jnp.concatenate(
        [jnp.zeros((B, S // 2), jnp.int32), jnp.ones((B, S // 2), jnp.int32)],
        axis=1)
    classification_labels = jax.random.randint(k_lbl, (B,), 0, NUM_CLASSES,
                                               dtype=jnp.int32)

    logits, loss = classifier_forward(params, input_ids, attention_mask,
                                      segment_id, classification_labels)
    jax.block_until_ready((logits, loss))

    # Inference path (no labels) exercises the logits-only variant.
    logits_only = classifier_forward(params, input_ids, attention_mask,
                                     segment_id)[0]
    jax.block_until_ready(logits_only)

    assert logits.shape == (B, NUM_CLASSES)
    assert logits_only.shape == (B, NUM_CLASSES)
    assert loss.shape == ()
    assert bool(jnp.isfinite(loss)) and bool(jnp.all(jnp.isfinite(logits)))
    print("KERNEL_OK")
</pallas_src>

<mosaic_0001>
module attributes {stable_mosaic.version = 11 : i64} {
  func.func @_classifier_kernel(%arg0: i32, %arg1: i32, %arg2: memref<2x1x768xbf16, #tpu.memory_space<vmem>>, %arg3: memref<2x8x768xbf16, #tpu.memory_space<vmem>>, %arg4: memref<2x8xf32, #tpu.memory_space<vmem>>, %arg5: memref<2x1xi32, #tpu.memory_space<vmem>>, %arg6: memref<768x768xbf16, #tpu.memory_space<vmem>>, %arg7: memref<1x768xf32, #tpu.memory_space<vmem>>, %arg8: memref<768x128xbf16, #tpu.memory_space<vmem>>, %arg9: memref<1x128xf32, #tpu.memory_space<vmem>>, %arg10: memref<2x128xf32, #tpu.memory_space<vmem>>, %arg11: memref<2x1xf32, #tpu.memory_space<vmem>>, %arg12: memref<2x1x1xf32, #tpu.memory_space<vmem>>, %arg13: memref<2x1x1xf32, #tpu.memory_space<vmem>>, %arg14: memref<2x1x768xf32, #tpu.memory_space<vmem>>) attributes {dimension_semantics = [#tpu.dimension_semantics<parallel>, #tpu.dimension_semantics<arbitrary>], iteration_bounds = array<i64: 1, 1>, scalar_prefetch = 0 : i64, scratch_operands = 3 : i64, tpu.core_type = #tpu.core_type<tc>, window_params = [{transform_indices = @transform_0, window_bounds = array<i64: 2, 1, 768>}, {transform_indices = @transform_1, window_bounds = array<i64: 2, 8, 768>}, {transform_indices = @transform_2, window_bounds = array<i64: 2, 8>}, {transform_indices = @transform_3, window_bounds = array<i64: 2, 1>}, {pipeline_mode = #tpu.pipeline_mode<synchronous>, transform_indices = @transform_4, window_bounds = array<i64: 768, 768>}, {pipeline_mode = #tpu.pipeline_mode<synchronous>, transform_indices = @transform_5, window_bounds = array<i64: 1, 768>}, {pipeline_mode = #tpu.pipeline_mode<synchronous>, transform_indices = @transform_6, window_bounds = array<i64: 768, 128>}, {pipeline_mode = #tpu.pipeline_mode<synchronous>, transform_indices = @transform_7, window_bounds = array<i64: 1, 128>}, {transform_indices = @transform_8, window_bounds = array<i64: 2, 128>}, {transform_indices = @transform_9, window_bounds = array<i64: 2, 1>}]} {
    %c0_i32 = arith.constant 0 : i32
    %0 = arith.cmpi eq, %arg1, %c0_i32 : i32
    %1 = arith.extui %0 : i1 to i32
    %c0_i32_0 = arith.constant 0 : i32
    %2 = arith.cmpi ne, %1, %c0_i32_0 : i32
    scf.if %2 {
      %cst_32 = arith.constant -1.000000e+30 : f32
      %40 = vector.broadcast %cst_32 : f32 to vector<2x1x1xf32>
      %c0_33 = arith.constant 0 : index
      %c0_34 = arith.constant 0 : index
      %c0_35 = arith.constant 0 : index
      %41 = vector.load %arg12[%c0_33, %c0_34, %c0_35] : memref<2x1x1xf32, #tpu.memory_space<vmem>>, vector<2x1x1xf32>
      tpu.vector_store %arg12[%c0_33, %c0_34, %c0_35], %40 {strides = array<i32>} : memref<2x1x1xf32, #tpu.memory_space<vmem>>, vector<2x1x1xf32>,
      %cst_36 = arith.constant 0.000000e+00 : f32
      %42 = vector.broadcast %cst_36 : f32 to vector<2x1x1xf32>
      %c0_37 = arith.constant 0 : index
      %c0_38 = arith.constant 0 : index
      %c0_39 = arith.constant 0 : index
      %43 = vector.load %arg13[%c0_37, %c0_38, %c0_39] : memref<2x1x1xf32, #tpu.memory_space<vmem>>, vector<2x1x1xf32>
      tpu.vector_store %arg13[%c0_37, %c0_38, %c0_39], %42 {strides = array<i32>} : memref<2x1x1xf32, #tpu.memory_space<vmem>>, vector<2x1x1xf32>,
      %cst_40 = arith.constant 0.000000e+00 : f32
      %44 = vector.broadcast %cst_40 : f32 to vector<2x1x768xf32>
      %c0_41 = arith.constant 0 : index
      %c0_42 = arith.constant 0 : index
      %c0_43 = arith.constant 0 : index
      %45 = vector.load %arg14[%c0_41, %c0_42, %c0_43] : memref<2x1x768xf32, #tpu.memory_space<vmem>>, vector<2x1x768xf32>
      tpu.vector_store %arg14[%c0_41, %c0_42, %c0_43], %44 {strides = array<i32>} : memref<2x1x768xf32, #tpu.memory_space<vmem>>, vector<2x1x768xf32>,
    } else {
    }
    %c0 = arith.constant 0 : index
    %c0_1 = arith.constant 0 : index
    %c0_2 = arith.constant 0 : index
    %3 = vector.load %arg2[%c0, %c0_1, %c0_2] : memref<2x1x768xbf16, #tpu.memory_space<vmem>>, vector<2x1x768xbf16>
    %c0_3 = arith.constant 0 : index
    %c0_4 = arith.constant 0 : index
    %c0_5 = arith.constant 0 : index
    %4 = vector.load %arg3[%c0_3, %c0_4, %c0_5] : memref<2x8x768xbf16, #tpu.memory_space<vmem>>, vector<2x8x768xbf16>
    %c0_6 = arith.constant 0 : index
    %c0_7 = arith.constant 0 : index
    %5 = vector.load %arg4[%c0_6, %c0_7] : memref<2x8xf32, #tpu.memory_space<vmem>>, vector<2x8xf32>
    "tpu.trace_start"() <{level = 10 : i32, message = "bkh,bqh->bkq"}> : () -> ()
    %cst = arith.constant dense<0.000000e+00> : vector<2x8x1xf32>
    %6 = tpu.matmul %4, %3, %cst {dimension_numbers = #tpu.dot_dimension_numbers<[2], [2], [1], [1], [0, 0, 0, 1, 1, 1], [0], [0]>} : vector<2x8x768xbf16>, vector<2x1x768xbf16>, vector<2x8x1xf32> -> vector<2x8x1xf32>
    "tpu.trace_stop"() : () -> ()
    %cst_8 = arith.constant 0.0360843912 : f32
    %7 = vector.broadcast %cst_8 : f32 to vector<2x8x1xf32>
    %8 = arith.mulf %6, %7 : vector<2x8x1xf32>
    %9 = vector.shape_cast %5 : vector<2x8xf32> to vector<2x8x1xf32>
    %10 = arith.addf %8, %9 : vector<2x8x1xf32>
    %c0_9 = arith.constant 0 : index
    %c0_10 = arith.constant 0 : index
    %c0_11 = arith.constant 0 : index
    %11 = vector.load %arg12[%c0_9, %c0_10, %c0_11] : memref<2x1x1xf32, #tpu.memory_space<vmem>>, vector<2x1x1xf32>
    %cst_12 = arith.constant dense<0xFF800000> : vector<2x1xf32>
    %12 = vector.multi_reduction <maximumf>, %10, %cst_12 [1] : vector<2x8x1xf32> to vector<2x1xf32>
    %13 = vector.shape_cast %12 : vector<2x1xf32> to vector<2x1x1xf32>
    %14 = arith.maximumf %11, %13 : vector<2x1x1xf32>
    %15 = arith.subf %11, %14 : vector<2x1x1xf32>
    %16 = math.exp %15 : vector<2x1x1xf32>
    %17 = vector.broadcast %14 : vector<2x1x1xf32> to vector<2x8x1xf32>
    %18 = arith.subf %10, %17 : vector<2x8x1xf32>
    %19 = math.exp %18 : vector<2x8x1xf32>
    %c0_13 = arith.constant 0 : index
    %c0_14 = arith.constant 0 : index
    %c0_15 = arith.constant 0 : index
    %20 = vector.load %arg13[%c0_13, %c0_14, %c0_15] : memref<2x1x1xf32, #tpu.memory_space<vmem>>, vector<2x1x1xf32>
    %21 = arith.mulf %16, %20 : vector<2x1x1xf32>
    %cst_16 = arith.constant dense<0.000000e+00> : vector<2x1xf32>
    %22 = vector.multi_reduction <add>, %19, %cst_16 [1] : vector<2x8x1xf32> to vector<2x1xf32>
    %23 = vector.shape_cast %22 : vector<2x1xf32> to vector<2x1x1xf32>
    %24 = arith.addf %21, %23 : vector<2x1x1xf32>
    %c0_17 = arith.constant 0 : index
    %c0_18 = arith.constant 0 : index
    %c0_19 = arith.constant 0 : index
    %25 = vector.load %arg13[%c0_17, %c0_18, %c0_19] : memref<2x1x1xf32, #tpu.memory_space<vmem>>, vector<2x1x1xf32>
    tpu.vector_store %arg13[%c0_17, %c0_18, %c0_19], %24 {strides = array<i32>} : memref<2x1x1xf32, #tpu.memory_space<vmem>>, vector<2x1x1xf32>,
    %26 = arith.extf %4 : vector<2x8x768xbf16> to vector<2x8x768xf32>
    %27 = vector.broadcast %19 : vector<2x8x1xf32> to vector<2x8x768xf32>
    %28 = arith.mulf %27, %26 : vector<2x8x768xf32>
    %cst_20 = arith.constant dense<0.000000e+00> : vector<2x768xf32>
    %29 = vector.multi_reduction <add>, %28, %cst_20 [1] : vector<2x8x768xf32> to vector<2x768xf32>
    %30 = vector.shape_cast %29 : vector<2x768xf32> to vector<2x1x768xf32>
    %c0_21 = arith.constant 0 : index
    %c0_22 = arith.constant 0 : index
    %c0_23 = arith.constant 0 : index
    %31 = vector.load %arg14[%c0_21, %c0_22, %c0_23] : memref<2x1x768xf32, #tpu.memory_space<vmem>>, vector<2x1x768xf32>
    %32 = vector.broadcast %16 : vector<2x1x1xf32> to vector<2x1x768xf32>
    %33 = arith.mulf %32, %31 : vector<2x1x768xf32>
    %34 = arith.addf %33, %30 : vector<2x1x768xf32>
    %c0_24 = arith.constant 0 : index
    %c0_25 = arith.constant 0 : index
    %c0_26 = arith.constant 0 : index
    %35 = vector.load %arg14[%c0_24, %c0_25, %c0_26] : memref<2x1x768xf32, #tpu.memory_space<vmem>>, vector<2x1x768xf32>
    tpu.vector_store %arg14[%c0_24, %c0_25, %c0_26], %34 {strides = array<i32>} : memref<2x1x768xf32, #tpu.memory_space<vmem>>, vector<2x1x768xf32>,
    %c0_27 = arith.constant 0 : index
    %c0_28 = arith.constant 0 : index
    %c0_29 = arith.constant 0 : index
    %36 = vector.load %arg12[%c0_27, %c0_28, %c0_29] : memref<2x1x1xf32, #tpu.memory_space<vmem>>, vector<2x1x1xf32>
    tpu.vector_store %arg12[%c0_27, %c0_28, %c0_29], %14 {strides = array<i32>} : memref<2x1x1xf32, #tpu.memory_space<vmem>>, vector<2x1x1xf32>,
    %c0_i32_30 = arith.constant 0 : i32
    %37 = arith.cmpi eq, %arg1, %c0_i32_30 : i32
    %38 = arith.extui %37 : i1 to i32
    %c0_i32_31 = arith.constant 0 : i32
    %39 = arith.cmpi ne, %38, %c0_i32_31 : i32
    scf.if %39 {
      %c0_32 = arith.constant 0 : index
      %c0_33 = arith.constant 0 : index
      %c0_34 = arith.constant 0 : index
      %40 = vector.load %arg14[%c0_32, %c0_33, %c0_34] : memref<2x1x768xf32, #tpu.memory_space<vmem>>, vector<2x1x768xf32>
      %c0_35 = arith.constant 0 : index
      %c0_36 = arith.constant 0 : index
      %c0_37 = arith.constant 0 : index
      %41 = vector.load %arg13[%c0_35, %c0_36, %c0_37] : memref<2x1x1xf32, #tpu.memory_space<vmem>>, vector<2x1x1xf32>
      %42 = tpu.reciprocal %41 : vector<2x1x1xf32> -> vector<2x1x1xf32>
      %43 = vector.broadcast %42 : vector<2x1x1xf32> to vector<2x1x768xf32>
      %44 = arith.mulf %40, %43 : vector<2x1x768xf32>
      %45 = vector.shape_cast %44 : vector<2x1x768xf32> to vector<2x768xf32>
      %46 = vector.shape_cast %3 : vector<2x1x768xbf16> to vector<2x768xbf16>
      %47 = arith.extf %46 : vector<2x768xbf16> to vector<2x768xf32>
      %48 = arith.addf %45, %47 : vector<2x768xf32>
      %49 = arith.truncf %48 : vector<2x768xf32> to vector<2x768xbf16>
      %c0_38 = arith.constant 0 : index
      %c0_39 = arith.constant 0 : index
      %50 = vector.load %arg6[%c0_38, %c0_39] : memref<768x768xbf16, #tpu.memory_space<vmem>>, vector<768x768xbf16>
      %cst_40 = arith.constant dense<0.000000e+00> : vector<2x768xf32>
      %51 = tpu.matmul %49, %50, %cst_40 {dimension_numbers = #tpu.dot_dimension_numbers<[1], [0], [0], [1], [0, 0, 1, 1], [], []>} : vector<2x768xbf16>, vector<768x768xbf16>, vector<2x768xf32> -> vector<2x768xf32>
      %c0_41 = arith.constant 0 : index
      %c0_42 = arith.constant 0 : index
      %52 = vector.load %arg7[%c0_41, %c0_42] : memref<1x768xf32, #tpu.memory_space<vmem>>, vector<1x768xf32>
      %53 = vector.broadcast %52 : vector<1x768xf32> to vector<2x768xf32>
      %54 = arith.addf %51, %53 : vector<2x768xf32>
      %55 = math.tanh %54 : vector<2x768xf32>
      %56 = arith.truncf %55 : vector<2x768xf32> to vector<2x768xbf16>
      %c0_43 = arith.constant 0 : index
      %c0_44 = arith.constant 0 : index
      %57 = vector.load %arg8[%c0_43, %c0_44] : memref<768x128xbf16, #tpu.memory_space<vmem>>, vector<768x128xbf16>
      %cst_45 = arith.constant dense<0.000000e+00> : vector<2x128xf32>
      %58 = tpu.matmul %56, %57, %cst_45 {dimension_numbers = #tpu.dot_dimension_numbers<[1], [0], [0], [1], [0, 0, 1, 1], [], []>} : vector<2x768xbf16>, vector<768x128xbf16>, vector<2x128xf32> -> vector<2x128xf32>
      %c0_46 = arith.constant 0 : index
      %c0_47 = arith.constant 0 : index
      %59 = vector.load %arg9[%c0_46, %c0_47] : memref<1x128xf32, #tpu.memory_space<vmem>>, vector<1x128xf32>
      %60 = vector.broadcast %59 : vector<1x128xf32> to vector<2x128xf32>
      %61 = arith.addf %58, %60 : vector<2x128xf32>
      %c0_48 = arith.constant 0 : index
      %c0_49 = arith.constant 0 : index
      %62 = vector.load %arg10[%c0_48, %c0_49] : memref<2x128xf32, #tpu.memory_space<vmem>>, vector<2x128xf32>
      tpu.vector_store %arg10[%c0_48, %c0_49], %61 {strides = array<i32>} : memref<2x128xf32, #tpu.memory_space<vmem>>, vector<2x128xf32>,
      %63 = tpu.iota {dimensions = array<i32: 1>} : vector<2x128xi32>
      %c5_i32 = arith.constant 5 : i32
      %64 = vector.broadcast %c5_i32 : i32 to vector<2x128xi32>
      %65 = arith.cmpi slt, %63, %64 : vector<2x128xi32>
      %cst_50 = arith.constant -1.000000e+30 : f32
      %66 = vector.broadcast %cst_50 : f32 to vector<2x128xf32>
      %67 = arith.select %65, %61, %66 : vector<2x128xi1>, vector<2x128xf32>
      %cst_51 = arith.constant dense<0xFF800000> : vector<2xf32>
      %68 = vector.multi_reduction <maximumf>, %67, %cst_51 [1] : vector<2x128xf32> to vector<2xf32>
      %69 = vector.shape_cast %68 : vector<2xf32> to vector<2x1xf32>
      %70 = vector.broadcast %69 : vector<2x1xf32> to vector<2x128xf32>
      %71 = arith.subf %67, %70 : vector<2x128xf32>
      %72 = math.exp %71 : vector<2x128xf32>
      %cst_52 = arith.constant dense<0.000000e+00> : vector<2xf32>
      %73 = vector.multi_reduction <add>, %72, %cst_52 [1] : vector<2x128xf32> to vector<2xf32>
      %74 = vector.shape_cast %73 : vector<2xf32> to vector<2x1xf32>
      %75 = math.log %74 : vector<2x1xf32>
      %76 = arith.addf %69, %75 : vector<2x1xf32>
      %c0_53 = arith.constant 0 : index
      %c0_54 = arith.constant 0 : index
      %77 = vector.load %arg5[%c0_53, %c0_54] : memref<2x1xi32, #tpu.memory_space<vmem>>, vector<2x1xi32>
      %78 = vector.broadcast %77 : vector<2x1xi32> to vector<2x128xi32>
      %79 = arith.cmpi eq, %63, %78 : vector<2x128xi32>
      %80 = arith.extui %79 : vector<2x128xi1> to vector<2x128xi32>
      %81 = arith.sitofp %80 : vector<2x128xi32> to vector<2x128xf32>
      %82 = arith.mulf %81, %61 : vector<2x128xf32>
      %cst_55 = arith.constant dense<0.000000e+00> : vector<2xf32>
      %83 = vector.multi_reduction <add>, %82, %cst_55 [1] : vector<2x128xf32> to vector<2xf32>
      %84 = vector.shape_cast %83 : vector<2xf32> to vector<2x1xf32>
      %85 = arith.subf %76, %84 : vector<2x1xf32>
      %c0_56 = arith.constant 0 : index
      %c0_57 = arith.constant 0 : index
      %86 = vector.load %arg11[%c0_56, %c0_57] : memref<2x1xf32, #tpu.memory_space<vmem>>, vector<2x1xf32>
      tpu.vector_store %arg11[%c0_56, %c0_57], %85 {strides = array<i32>} : memref<2x1xf32, #tpu.memory_space<vmem>>, vector<2x1xf32>,
    } else {
    }
    return
  }
  func.func @transform_0(%arg0: i32, %arg1: i32) -> (i32, i32, i32) {
    %c0_i32 = arith.constant 0 : i32
    %c0_i32_0 = arith.constant 0 : i32
    %c0_i32_1 = arith.constant 0 : i32
    return %arg0, %c0_i32, %c0_i32_0 : i32, i32, i32
  }
  func.func @transform_1(%arg0: i32, %arg1: i32) -> (i32, i32, i32) {
    %c0_i32 = arith.constant 0 : i32
    %c0_i32_0 = arith.constant 0 : i32
    return %arg0, %arg1, %c0_i32 : i32, i32, i32
  }
  func.func @transform_2(%arg0: i32, %arg1: i32) -> (i32, i32) {
    %c0_i32 = arith.constant 0 : i32
    return %arg0, %arg1 : i32, i32
  }
  func.func @transform_3(%arg0: i32, %arg1: i32) -> (i32, i32) {
    %c0_i32 = arith.constant 0 : i32
    %c0_i32_0 = arith.constant 0 : i32
    return %arg0, %c0_i32 : i32, i32
  }
  func.func @transform_4(%arg0: i32, %arg1: i32) -> (i32, i32) {
    %c0_i32 = arith.constant 0 : i32
    %c0_i32_0 = arith.constant 0 : i32
    %c0_i32_1 = arith.constant 0 : i32
    return %c0_i32, %c0_i32_0 : i32, i32
  }
  func.func @transform_5(%arg0: i32, %arg1: i32) -> (i32, i32) {
    %c0_i32 = arith.constant 0 : i32
    %c0_i32_0 = arith.constant 0 : i32
    %c0_i32_1 = arith.constant 0 : i32
    return %c0_i32, %c0_i32_0 : i32, i32
  }
  func.func @transform_6(%arg0: i32, %arg1: i32) -> (i32, i32) {
    %c0_i32 = arith.constant 0 : i32
    %c0_i32_0 = arith.constant 0 : i32
    %c0_i32_1 = arith.constant 0 : i32
    return %c0_i32, %c0_i32_0 : i32, i32
  }
  func.func @transform_7(%arg0: i32, %arg1: i32) -> (i32, i32) {
    %c0_i32 = arith.constant 0 : i32
    %c0_i32_0 = arith.constant 0 : i32
    %c0_i32_1 = arith.constant 0 : i32
    return %c0_i32, %c0_i32_0 : i32, i32
  }
  func.func @transform_8(%arg0: i32, %arg1: i32) -> (i32, i32) {
    %c0_i32 = arith.constant 0 : i32
    %c0_i32_0 = arith.constant 0 : i32
    return %arg0, %c0_i32 : i32, i32
  }
  func.func @transform_9(%arg0: i32, %arg1: i32) -> (i32, i32) {
    %c0_i32 = arith.constant 0 : i32
    %c0_i32_0 = arith.constant 0 : i32
    return %arg0, %c0_i32 : i32, i32
  }
}

</mosaic_0001>

<bundles_post_ra>
// kernel: _classifier_head_call.1
= control target key start
LH: loop header
LB: loop body
LE: loop exit
PB: predicated region body
PF: predicated region fallthrough
CT: control target
= control target key end

     0   :  { %15 = vsyncpa [#allocation6], 0  ;;  %s5126_s0 = inlined_call_operand.vmem [shape: bf16[2,1,768], index: 0, kind: input, shape index: {}]   ;;  %s5127_s1 = inlined_call_operand.hbm [shape: bf16[2,8,768], index: 1, kind: input, shape index: {}]   ;;  %s5128_s2 = inlined_call_operand.hbm [shape: f32[2,8], index: 2, kind: input, shape index: {}]   ;;  %s5129_s3 = inlined_call_operand.vmem [shape: s32[2,1], index: 3, kind: input, shape index: {}]   ;;  %s5130_s4 = inlined_call_operand.hbm [shape: bf16[768,768], index: 4, kind: input, shape index: {}]   ;;  %s5131_s5 = inlined_call_operand.hbm [shape: f32[1,768], index: 5, kind: input, shape index: {}]   ;;  %s5132_s6 = inlined_call_operand.hbm [shape: bf16[768,128], index: 6, kind: input, shape index: {}]   ;;  %s5133_s7 = inlined_call_operand.hbm [shape: f32[1,128], index: 7, kind: input, shape index: {}]   ;;  %s5134_s8 = inlined_call_operand.hbm [shape: f32[2,128], index: 8, kind: output, shape index: {0}]   ;;  %s5135_s9 = inlined_call_operand.vmem [shape: f32[2,1], index: 9, kind: output, shape index: {1}]  }
   0x1   :  { %16 = vsyncpa [#allocation9], 0 }
   0x2   :  { %17 = vsyncpa [#allocation12], 0 }
   0x3   :  { %18 = vsyncpa [#allocation15], 0 }
   0x4   :  { %19 = vsyncpa [#allocation7], 0  ;;  %s4852_s30 = smov [#allocation8]   ;;  %s4853_s11 = smov [#allocation11]  }
   0x5   :  { %s40_s10 = sshll.u32 %s4852_s30, 4  ;;  %s64_s12 = sshll.u32 %s4853_s11, 4  ;;  %s41_s10 = int_to_ptr.vmem [resolvable:$true] %s40_s10  ;;  %s65_s12 = int_to_ptr.vmem [resolvable:$true] %s64_s12 }
   0x6   :  { %s4710_s13 = scalar_lea.vmem %s41_s10, 32  ;;  %p4715_p1 = scmp.lt.s32.totalorder %s41_s10, %s41_s10 }
   0x7   :  { %p4711_p0 = scmp.ne.s32.totalorder %s41_s10, %s4710_s13  ;;  %p4716_p2 = scmp.lt.s32.totalorder %s4710_s13, %s4710_s13 }
   0x9   :  { %p4717_p3 = por %p4716_p2, %p4715_p1 }
   0xb   :  { %p4718_p4 = pnand %p4717_p3, %p4711_p0 }
   0xd   :  { %4721 = shalt.err (!%p4718_p4)
}
   0xe   :  { %43 = dma.hbm_to_vmem [thread:$0]  %s5128_s2, 32, %s41_s10, [#allocation9]  }
   0xf   :  { %s4730_s16 = scalar_lea.vmem %s65_s12, 96  ;;  %p4735_p6 = scmp.lt.s32.totalorder %s65_s12, %s65_s12 }
  0x10   :  { %p4731_p5 = scmp.ne.s32.totalorder %s65_s12, %s4730_s16  ;;  %p4736_p7 = scmp.lt.s32.totalorder %s4730_s16, %s4730_s16 }
  0x12   :  { %p4737_p8 = por %p4736_p7, %p4735_p6 }
  0x14   :  { %p4738_p9 = pnand %p4737_p8, %p4731_p5 }
  0x16   :  { %4741 = shalt.err (!%p4738_p9)
}
  0x17   :  { %67 = dma.hbm_to_vmem [thread:$0]  %s5131_s5, 96, %s65_s12, [#allocation12]  }
  0x18   :  { %s4854_s19 = smov [#allocation5]  }
  0x19   :  { %s27_s20 = sshll.u32 %s4854_s19, 4  ;;  %s28_s20 = int_to_ptr.vmem [resolvable:$true] %s27_s20 }
  0x1a   :  { %s4750_s21 = scalar_lea.vmem %s28_s20, 768  ;;  %p4755_p11 = scmp.lt.s32.totalorder %s28_s20, %s28_s20 }
  0x1b   :  { %p4751_p10 = scmp.ne.s32.totalorder %s28_s20, %s4750_s21  ;;  %p4756_p12 = scmp.lt.s32.totalorder %s4750_s21, %s4750_s21 }
  0x1d   :  { %p4757_p13 = por %p4756_p12, %p4755_p11 }
  0x1f   :  { %p4758_p0 = pnand %p4757_p13, %p4751_p10 }
  0x21   :  { %4761 = shalt.err (!%p4758_p0)
}
  0x22   :  { %s4855_s2 = smov 384   ;;  %s4856_s22 = smov 24  }
  0x23   :  { %33 = dma.hbm_to_vmem [thread:$0]  %s5127_s1, 768, %s28_s20, [#allocation6], %s4855_s2, %s4855_s2, %s4856_s22  }
  0x24   :  { %s4857_s25 = smov [#allocation10]   ;;  %s4858_s5 = smov [#allocation13]  }
  0x25   :  { %s51_s26 = sshll.u32 %s4857_s25, 4  ;;  %s73_s27 = sshll.u32 %s4858_s5, 4  ;;  %s52_s26 = int_to_ptr.vmem [resolvable:$true] %s51_s26  ;;  %s74_s27 = int_to_ptr.vmem [resolvable:$true] %s73_s27 }
  0x26   :  { %s4770_s28 = scalar_lea.vmem %s52_s26, 36864  ;;  %p4775_p2 = scmp.lt.s32.totalorder %s52_s26, %s52_s26 }
  0x27   :  { %p4771_p1 = scmp.ne.s32.totalorder %s52_s26, %s4770_s28  ;;  %p4776_p3 = scmp.lt.s32.totalorder %s4770_s28, %s4770_s28 }
  0x29   :  { %p4777_p4 = por %p4776_p3, %p4775_p2 }
  0x2b   :  { %p4778_p5 = pnand %p4777_p4, %p4771_p1 }
  0x2d   :  { %4781 = shalt.err (!%p4778_p5)
}
  0x2e   :  { %57 = dma.hbm_to_vmem [thread:$0]  %s5130_s4, 36864, %s52_s26, [#allocation9], %s4855_s2, %s4855_s2, %s4856_s22  }
  0x2f   :  { %s4790_s10 = scalar_lea.vmem %s74_s27, 6144  ;;  %p4795_p7 = scmp.lt.s32.totalorder %s74_s27, %s74_s27 }
  0x30   :  { %p4791_p6 = scmp.ne.s32.totalorder %s74_s27, %s4790_s10  ;;  %p4796_p8 = scmp.lt.s32.totalorder %s4790_s10, %s4790_s10 }
  0x32   :  { %p4797_p9 = por %p4796_p8, %p4795_p7 }
  0x34   :  { %p4798_p10 = pnand %p4797_p9, %p4791_p6 }
  0x36   :  { %4801 = shalt.err (!%p4798_p10)
}
  0x37   :  { %s4859_s1 = smov 64   ;;  %s4860_s11 = smov 4  }
  0x38   :  { %79 = dma.hbm_to_vmem [thread:$0]  %s5132_s6, 6144, %s74_s27, [#allocation12], %s4859_s1, %s4859_s1, %s4860_s11  }
  0x39   :  { %s4861_s14 = smov [#allocation14]  }
  0x3a   :  { %s86_s15 = sshll.u32 %s4861_s14, 4  ;;  %s87_s15 = int_to_ptr.vmem [resolvable:$true] %s86_s15 }
  0x3b   :  { %s4810_s16 = scalar_lea.vmem %s87_s15, 16  ;;  %s4814_s4 = scalar_lea.vmem %s87_s15, 32 }
  0x3c   :  { %p4811_p11 = scmp.ne.s32.totalorder %s87_s15, %s4810_s16  ;;  %p4815_p12 = scmp.lt.s32.totalorder %s87_s15, %s87_s15 }
  0x3d   :  { %p4816_p13 = scmp.lt.s32.totalorder %s4814_s4, %s4810_s16 }
  0x3f   :  { %p4817_p0 = por %p4816_p13, %p4815_p12 }
  0x41   :  { %p4818_p1 = pnand %p4817_p0, %p4811_p11 }
  0x43   :  { %4821 = shalt.err (!%p4818_p1)
}
  0x44   :  { %89 = dma.hbm_to_vmem [thread:$0]  %s5133_s7, 16, %s87_s15, [#allocation15]  }
  0x45   :  { %4842 = dma.done.wait [#allocation6], 768  }
  0x46   :  { %4843 = vsyncadd [#allocation6], 4294966528 }
  0x47   :  { %4844 = dma.done.wait [#allocation9], 36896  }
  0x48   :  { %4845 = vsyncadd [#allocation9], 4294930400 }
  0x49   :  { %4846 = dma.done.wait [#allocation12], 6240  }
  0x4a   :  { %4847 = vsyncadd [#allocation12], 4294961056 }
  0x4b   :  { %4848 = dma.done.wait [#allocation15], 16  }
  0x4c   :  { %4849 = vsyncadd [#allocation15], 4294967280  ;;  %v118_v0 = vlaneseq  ;;  %v4862_v1 = vmov 1966171168   ;;  %v124_v6 = vld [vmem:[%s5126_s0] sm:$0x3f] }
  0x4d   :  { %v157_v2 = vunpack.c.l.s4 %v4862_v1  ;;  %v126_v7 = vld [vmem:[#allocation5] sm:$0xff]  ;;  %v125_v10 = vld [vmem:[%s5126_s0 + $0x6] sm:$0x3f]  ;;  %v155_v12 = vcombine.high %v124_v6, %v124_v6  ;;  %v132_v18 = vld [vmem:[#allocation8] sm:$0x3]  ;;  %vm113_vm0 = vcmask 0  }
  0x4e   :  { %v4936_v3 = vshrl.u32 %v118_v0, 7  ;;  %v3740_v9 = vcombine.high %v126_v7, %v126_v7  ;;  %v130_v13 = vld [vmem:[#allocation5 + $0x20] sm:$0xff]  ;;  %v127_v20 = vld [vmem:[#allocation5 + $0x8] sm:$0xff]  ;;  %v3739_v29 = vcombine.low %v126_v7, %v126_v7  ;;  %v128_v36 = vld [vmem:[#allocation5 + $0x10] sm:$0xff]  ;;  %v350_v37 = vcombine.high %v125_v10, %v125_v10 }
  0x4f   :  { %v158_v4 = vunpack.c.0.s8 %v157_v2  ;;  %v3748_v24 = vcombine.high %v130_v13, %v130_v13  ;;  %v3742_v33 = vcombine.high %v127_v20, %v127_v20  ;;  %v3747_v38 = vcombine.low %v130_v13, %v130_v13  ;;  %v129_v43 = vld [vmem:[#allocation5 + $0x18] sm:$0xff]  ;;  %v131_v48 = vld [vmem:[#allocation5 + $0x28] sm:$0xff] }
  0x50   :  { %240 = vmatprep.mubr.bf16.mxu1 %v3740_v9  ;;  %v4953_v22 = vsub.s32 1, %v4936_v3  ;;  %v4958_v27 = vsub.s32 0, %v4936_v3  ;;  %v3741_v39 = vcombine.low %v127_v20, %v127_v20  ;;  %v3744_v41 = vcombine.high %v128_v36, %v128_v36  ;;  %v4186_v56 = vld [vmem:[#allocation10 + $0x150] ss:$24 sps:$4 sm:$0xff]   ;;  %v4188_v57 = vld [vmem:[#allocation10 + $0x154] ss:$24 sps:$4 sm:$0xff]  }
  0x51   :  { %v4939_v5 = vsub.s32 %v158_v4, %v4936_v3  ;;  %475 = vmatprep.mubr.bf16.mxu0 %v3748_v24  ;;  %v3743_v45 = vcombine.low %v128_v36, %v128_v36  ;;  %v3746_v46 = vcombine.high %v129_v43, %v129_v43  ;;  %v3745_v49 = vcombine.low %v129_v43, %v129_v43  ;;  %v4189_v58 = vld [vmem:[#allocation10 + $0x450] ss:$24 sps:$4 sm:$0xff]   ;;  %v4191_v59 = vld [vmem:[#allocation10 + $0x454] ss:$24 sps:$4 sm:$0xff]   ;;  %v4194_v60 = vld [vmem:[#allocation10 + $0x124] ss:$24 sps:$4 sm:$0xff]  }
  0x52   :  { %v535_v31 = vrot.slane %v132_v18, %v4953_v22  ;;  %v528_v35 = vrot.slane %v132_v18, %v4958_v27  ;;  %v3750_v51 = vcombine.high %v131_v48, %v131_v48  ;;  %v3749_v52 = vcombine.low %v131_v48, %v131_v48  ;;  %v4197_v61 = vld [vmem:[#allocation10 + $0x424] ss:$24 sps:$4 sm:$0xff]   ;;  %v4192_v63 = vld [vmem:[#allocation10 + $0x120] ss:$24 sps:$4 sm:$0xff]  }
  0x53   :  { %v162_v8 = vrot.slane %v124_v6, %v4939_v5  ;;  %v169_v16 = vrot.slane %v155_v12, %v4939_v5  ;;  %v357_v17 = vrot.slane %v125_v10, %v4939_v5  ;;  %v364_v42 = vrot.slane %v350_v37, %v4939_v5  ;;  %v4195_v1 = vld [vmem:[#allocation10 + $0x420] ss:$24 sps:$4 sm:$0xff]  }
  0x54   :  { %537 = vbcast.lane.b32.xlu0 %v535_v31, 256  ;;  %v4863_v53 = vmov -1e+30   ;;  %v4864_v54 = vmov 0.0   ;;  %v4865_v55 = vmov 0   ;;  %vm4974_vm1 = vcmp.lt.s32.totalorder %v118_v0, 768 }
  0x55   :  { %v170_v11 = vcombine.high %v162_v8, %v162_v8  ;;  %v178_v14 = vrot.slane %v162_v8, %v4939_v5  ;;  %v365_v21 = vcombine.high %v357_v17, %v357_v17  ;;  %v373_v23 = vrot.slane %v357_v17, %v4939_v5  ;;  %114 = vst.msk [vmem:[#allocation2] sm:$0x1] %vm113_vm0, %v4863_v53 }
  0x56   :  { %v171_v25 = vcombine.high %v169_v16, %v169_v16  ;;  %v185_v40 = vrot.slane %v169_v16, %v4939_v5  ;;  %v366_v44 = vcombine.high %v364_v42, %v364_v42  ;;  %v380_v50 = vrot.slane %v364_v42, %v4939_v5  ;;  %116 = vst.msk [vmem:[#allocation3] sm:$0x1] %vm113_vm0, %v4864_v54 }
  0x57   :  { %v192_v15 = vrot.slane %v170_v11, %v4939_v5  ;;  %v387_v26 = vrot.slane %v365_v21, %v4939_v5  ;;  %v395_v28 = vcombine.high %v373_v23, %v373_v23  ;;  %v200_v32 = vcombine.high %v178_v14, %v178_v14  ;;  %115 = vst.msk [vmem:[#allocation2 + $0x1] sm:$0x1] %vm113_vm0, %v4863_v53 }
  0x58   :  { %v199_v34 = vrot.slane %v171_v25, %v4939_v5  ;;  %530 = vbcast.lane.b32.xlu0 %v528_v35, 256  ;;  %v394_v47 = vrot.slane %v366_v44, %v4939_v5  ;;  %117 = vst.msk [vmem:[#allocation3 + $0x1] sm:$0x1] %vm113_vm0, %v4864_v54  ;;  %4170 = vset.pattern.permute.xlu1 %v4865_v55  ;;  %vm543_vm2 = vcmask 7168   ;;  %vm1329_vm3 = vcmask 1041409  }
  0x59   :  { %v201_v19 = vcombine.high %v192_v15, %v192_v15  ;;  %222 = vmatprep.subr.bf16.mxu1 %v192_v15  ;;  %v396_v30 = vcombine.high %v387_v26, %v387_v26  ;;  %4171 = vset.pattern.permute.xlu0 %v4865_v55  ;;  %123 = vst.msk [vmem:[#allocation4 + $0x6] sm:$0x3f] %vm4974_vm1, %v4864_v54  ;;  %122 = vst.msk [vmem:[#allocation4] sm:$0x3f] %vm4974_vm1, %v4864_v54  ;;  %vm3690_vm6 = vcmask 1041408  }
  0x5a   :  { %223 = vmatpush1.bf16.xpose.msra.mxu1 %v178_v14 }
  0x5b   :  { %262 = vmatprep.subr.bf16.mxu1 %v201_v19  ;;  %457 = vmatprep.subr.bf16.mxu0 %v396_v30 }
  0x5c   :  { %458 = vmatpush1.bf16.xpose.msra.mxu0 %v395_v28 }
  0x5d   :  { %2793 = vmatprep.subr.bf16.mxu0 %v4188_v57 }
  0x61   :  { %241 = vmatmul.mubr.bf16.vlgmr.msra.gmra.mxu1 %v3739_v29 }
  0x62   :  { %263 = vmatpush1.bf16.xpose.msra.mxu1 %v200_v32  ;;  %280 = vmatprep.mubr.bf16.mxu1 %v3742_v33 }
  0x63   :  { %302 = vmatprep.subr.bf16.mxu1 %v199_v34  ;;  %476 = vmatmul.mubr.bf16.vlgmr.msra.gmra.mxu0 %v3747_v38 }
  0x64   :  { %2794 = vmatpush1.bf16.msra.mxu0 %v4186_v56 }
  0x65   :  { %2795 = vmatprep.subr.bf16.mxu0 %v4194_v60 }
  0x68   :  { %2796 = vmatpush1.bf16.msra.mxu0 %v4192_v63 }
  0x69   :  { %281 = vmatmul.mubr.bf16.vlgmr.msra.gmra.mxu1 %v3741_v39 }
  0x6a   :  { %303 = vmatpush1.bf16.xpose.msra.mxu1 %v185_v40  ;;  %320 = vmatprep.mubr.bf16.mxu1 %v3744_v41  ;;  %v541_v40 = vld [vmem:[#allocation2] sm:$0x1] }
  0x6b   :  { %417 = vmatprep.subr.bf16.mxu1 %v387_v26 }
  0x71   :  { %321 = vmatmul.mubr.bf16.vlgmr.msra.gmra.mxu1 %v3743_v45 }
  0x72   :  { %418 = vmatpush1.bf16.xpose.msra.mxu1 %v373_v23  ;;  %435 = vmatprep.mubr.bf16.mxu1 %v3746_v46 }
  0x73   :  { %497 = vmatprep.subr.bf16.mxu1 %v394_v47 }
  0x79   :  { %436 = vmatmul.mubr.bf16.vlgmr.msra.gmra.mxu1 %v3745_v49 }
  0x7a   :  { %498 = vmatpush1.bf16.xpose.msra.mxu1 %v380_v50  ;;  %515 = vmatprep.mubr.bf16.mxu1 %v3750_v51 }
  0x7b   :  { %2834 = vmatprep.subr.bf16.mxu1 %v4191_v59 }
  0x81   :  { %516 = vmatmul.mubr.bf16.vlgmr.msra.gmra.mxu1 %v3749_v52 }
  0x82   :  { %2835 = vmatpush1.bf16.msra.mxu1 %v4189_v58 }
  0x83   :  { %2836 = vmatprep.subr.bf16.mxu1 %v4197_v61  ;;  %v542_v61 = vld [vmem:[#allocation2 + $0x1] sm:$0x1] }
  0x86   :  { %2837 = vmatpush1.bf16.msra.mxu1 %v4195_v1 }
  0xc6   :  { %v538_v13 = vpop.permute.xlu0 %537 }
  0xca   :  { %v531_v21 = vpop.permute.xlu0 %530 }
 0x121   :  { %v242_v2 = vpop.f32.mrf.mxu1 }
 0x123   :  { %v244_v4 = vpop.f32.mrf.mxu1  ;;  %v477_v8 = vpop.f32.mrf.mxu0 }
 0x125   :  { %v245_v6 = vpop.f32.mrf.mxu1  ;;  %v479_v10 = vpop.f32.mrf.mxu0 }
 0x127   :  { %v246_v7 = vpop.f32.mrf.mxu1  ;;  %v480_v12 = vpop.f32.mrf.mxu0 }
 0x129   :  { %v282_v9 = vpop.f32.mrf.mxu1  ;;  %v481_v15 = vpop.f32.mrf.mxu0 }
 0x12a   :  { %v283_v17 = vadd.f32 %v282_v9, %v242_v2 }
 0x12b   :  { %v284_v11 = vpop.f32.mrf.mxu1 }
 0x12d   :  { %v285_v14 = vpop.f32.mrf.mxu1 }
 0x12f   :  { %v286_v16 = vpop.f32.mrf.mxu1 }
 0x130   :  { %v584_v16 = vld [vmem:[#allocation3] sm:$0x1] }
 0x131   :  { %v322_v18 = vpop.f32.mrf.mxu1 }
 0x132   :  { %v323_v19 = vadd.f32 %v322_v18, %v283_v17  ;;  %v4200_v17 = vld [vmem:[#allocation10 + $0xf4] ss:$24 sps:$4 sm:$0xff]  }
 0x133   :  { %v324_v20 = vpop.f32.mrf.mxu1  ;;  %v4203_v18 = vld [vmem:[#allocation10 + $0x3f4] ss:$24 sps:$4 sm:$0xff]   ;;  %2797 = vmatprep.subr.bf16.mxu0 %v4200_v17  ;;  %v4254_v17 = vld [vmem:[#allocation10 + $0x244] ss:$24 sps:$4 sm:$0xff]  }
 0x134   :  { %v523_v23 = vmul.f32 0.03608439, %v323_v19  ;;  %v4198_v20 = vld [vmem:[#allocation10 + $0xf0] ss:$24 sps:$4 sm:$0xff]   ;;  %2838 = vmatprep.subr.bf16.mxu1 %v4203_v18  ;;  %v4257_v18 = vld [vmem:[#allocation10 + $0x544] ss:$24 sps:$4 sm:$0xff]  }
 0x135   :  { %v325_v24 = vpop.f32.mrf.mxu1  ;;  %2798 = vmatpush1.bf16.msra.mxu0 %v4198_v20  ;;  %v4255_v20 = vld [vmem:[#allocation10 + $0x540] ss:$24 sps:$4 sm:$0xff]  }
 0x136   :  { %v539_v25 = vadd.f32 %v531_v21, %v523_v23  ;;  %v4201_v21 = vld [vmem:[#allocation10 + $0x3f0] ss:$24 sps:$4 sm:$0xff]  }
 0x137   :  { %v326_v26 = vpop.f32.mrf.mxu1  ;;  %2839 = vmatpush1.bf16.msra.mxu1 %v4201_v21  ;;  %v4260_v21 = vld [vmem:[#allocation10 + $0x214] ss:$24 sps:$4 sm:$0xff]  }
 0x138   :  { %v544_v28 = vsel %vm543_vm2, %v539_v25, -inf }
 0x139   :  { %v545_v29 = vrot.slane %v544_v28, 4  ;;  %v437_v30 = vpop.f32.mrf.mxu1 }
 0x13a   :  { %v478_v37 = vadd.f32 %v477_v8, %v437_v30  ;;  %v4204_v30 = vld [vmem:[#allocation10 + $0xc0] ss:$24 sps:$4 sm:$0xff]  }
 0x13b   :  { %v546_v31 = vmax.f32 %v544_v28, %v545_v29  ;;  %v439_v32 = vpop.f32.mrf.mxu1  ;;  %v4206_v28 = vld [vmem:[#allocation10 + $0xc4] ss:$24 sps:$4 sm:$0xff]  }
 0x13c   :  { %v4209_v29 = vld [vmem:[#allocation10 + $0x3c4] ss:$24 sps:$4 sm:$0xff]   ;;  %2799 = vmatprep.subr.bf16.mxu0 %v4206_v28 }
 0x13d   :  { %v547_v33 = vrot.slane %v546_v31, 2  ;;  %v440_v34 = vpop.f32.mrf.mxu1  ;;  %2840 = vmatprep.subr.bf16.mxu1 %v4209_v29  ;;  %2800 = vmatpush1.bf16.msra.mxu0 %v4204_v30  ;;  %v4269_v28 = vld [vmem:[#allocation10 + $0x4e4] ss:$24 sps:$4 sm:$0xff]   ;;  %v4264_v29 = vld [vmem:[#allocation10 + $0x1e0] ss:$24 sps:$4 sm:$0xff]  }
 0x13e   :  { %v4267_v30 = vld [vmem:[#allocation10 + $0x4e0] ss:$24 sps:$4 sm:$0xff]  }
 0x13f   :  { %v548_v35 = vmax.f32 %v546_v31, %v547_v33  ;;  %v441_v36 = vpop.f32.mrf.mxu1  ;;  %v4207_v31 = vld [vmem:[#allocation10 + $0x3c0] ss:$24 sps:$4 sm:$0xff]  }
 0x140   :  { %2841 = vmatpush1.bf16.msra.mxu1 %v4207_v31  ;;  %v4272_v31 = vld [vmem:[#allocation10 + $0x1b4] ss:$24 sps:$4 sm:$0xff]  }
 0x141   :  { %v549_v38 = vrot.slane %v548_v35, 1  ;;  %v517_v39 = vpop.f32.mrf.mxu1 }
 0x142   :  { %v518_v41 = vadd.f32 %v517_v39, %v478_v37  ;;  %v585_v39 = vld [vmem:[#allocation3 + $0x1] sm:$0x1] }
 0x143   :  { %v550_v42 = vmax.f32 %v548_v35, %v549_v38  ;;  %v519_v43 = vpop.f32.mrf.mxu1 }
 0x144   :  { %v524_v44 = vmul.f32 0.03608439, %v518_v41  ;;  %v4212_v43 = vld [vmem:[#allocation10 + $0x94] ss:$24 sps:$4 sm:$0xff]  }
 0x145   :  { %v558_v45 = vmax.f32 %v541_v40, %v550_v42  ;;  %v520_v46 = vpop.f32.mrf.mxu1  ;;  %2801 = vmatprep.subr.bf16.mxu0 %v4212_v43 }
 0x146   :  { %v540_v47 = vadd.f32 %v538_v13, %v524_v44  ;;  %v4215_v44 = vld [vmem:[#allocation10 + $0x394] ss:$24 sps:$4 sm:$0xff]   ;;  %v4210_v46 = vld [vmem:[#allocation10 + $0x90] ss:$24 sps:$4 sm:$0xff]  }
 0x147   :  { %v571_v48 = vrot.slane %v558_v45, %v4958_v27  ;;  %837 = vst.msk [vmem:[#allocation2] sm:$0x1] %vm113_vm0, %v558_v45  ;;  %v521_v49 = vpop.f32.mrf.mxu1  ;;  %v560_v57 = vsub.f32 %v541_v40, %v558_v45  ;;  %2842 = vmatprep.subr.bf16.mxu1 %v4215_v44  ;;  %2802 = vmatpush1.bf16.msra.mxu0 %v4210_v46  ;;  %v4695_v44 = vld [vmem:[#allocation5 + $0x20] sm:$0xff] }
 0x148   :  { %v551_v50 = vsel %vm543_vm2, %v540_v47, -inf  ;;  %v4221_v49 = vld [vmem:[#allocation10 + $0x364] ss:$24 sps:$4 sm:$0xff]   ;;  %v616_v46 = vunpack.c.h.bf16 %v4695_v44 }
 0x149   :  { %v578_v51 = vsub.f32 %v539_v25, %v571_v48  ;;  %v552_v52 = vrot.slane %v551_v50, 4  ;;  %v562_v60 = vmul.f32 1.442695, %v560_v57  ;;  %v4218_v48 = vld [vmem:[#allocation10 + $0x64] ss:$24 sps:$4 sm:$0xff]  }
 0x14a   :  { %2803 = vmatprep.subr.bf16.mxu0 %v4218_v48 }
 0x14b   :  { %v580_v53 = vmul.f32 1.442695, %v578_v51  ;;  %v553_v55 = vmax.f32 %v551_v50, %v552_v52  ;;  %v4216_v50 = vld [vmem:[#allocation10 + $0x60] ss:$24 sps:$4 sm:$0xff]  }
 0x14c   :  { %v4219_v51 = vld [vmem:[#allocation10 + $0x360] ss:$24 sps:$4 sm:$0xff]   ;;  %2804 = vmatpush1.bf16.msra.mxu0 %v4216_v50  ;;  %v4697_v50 = vld [vmem:[#allocation5] sm:$0xff] }
 0x14d   :  { %4666 = vpow2.f32 %v580_v53  ;;  %v554_v56 = vrot.slane %v553_v55, 2  ;;  %v3703_v53 = vld [vmem:[%s5129_s3] sm:$0x3] }
 0x14e   :  { %4668 = vpow2.f32 %v562_v60  ;;  %v4230_v60 = vld [vmem:[#allocation10 + $0x4] ss:$24 sps:$4 sm:$0xff]  }
 0x14f   :  { %v555_v58 = vmax.f32 %v553_v55, %v554_v56  ;;  %v4224_v55 = vld [vmem:[#allocation10 + $0x34] ss:$24 sps:$4 sm:$0xff]  }
 0x150   :  { %v4227_v56 = vld [vmem:[#allocation10 + $0x334] ss:$24 sps:$4 sm:$0xff]   ;;  %2805 = vmatprep.subr.bf16.mxu0 %v4224_v55 }
 0x151   :  { %v556_v59 = vrot.slane %v555_v58, 1  ;;  %v4698_v55 = vld [vmem:[#allocation5 + $0x8] sm:$0xff] }
 0x153   :  { %v557_v63 = vmax.f32 %v555_v58, %v556_v59  ;;  %v4222_v58 = vld [vmem:[#allocation10 + $0x30] ss:$24 sps:$4 sm:$0xff]  }
 0x154   :  { %v4225_v59 = vld [vmem:[#allocation10 + $0x330] ss:$24 sps:$4 sm:$0xff]   ;;  %2806 = vmatpush1.bf16.msra.mxu0 %v4222_v58 }
 0x155   :  { %v559_v1 = vmax.f32 %v542_v61, %v557_v63  ;;  %v4228_v63 = vld [vmem:[#allocation10] ss:$24 sps:$4 sm:$0xff]   ;;  %2807 = vmatprep.subr.bf16.mxu0 %v4230_v60  ;;  %v610_v60 = vunpack.c.h.bf16 %v4698_v55 }
 0x157   :  { %v561_v2 = vsub.f32 %v542_v61, %v559_v1  ;;  %v575_v4 = vrot.slane %v559_v1, %v4958_v27  ;;  %838 = vst.msk [vmem:[#allocation2 + $0x1] sm:$0x1] %vm113_vm0, %v559_v1  ;;  %v4233_v61 = vld [vmem:[#allocation10 + $0x304] ss:$24 sps:$4 sm:$0xff]   ;;  %v4231_v1 = vld [vmem:[#allocation10 + $0x300] ss:$24 sps:$4 sm:$0xff]  }
 0x158   :  { %2808 = vmatpush1.bf16.msra.mxu0 %v4228_v63 }
 0x159   :  { %v564_v6 = vmul.f32 1.442695, %v561_v2  ;;  %v579_v7 = vsub.f32 %v540_v47, %v575_v4  ;;  %v4213_v47 = vld [vmem:[#allocation10 + $0x390] ss:$24 sps:$4 sm:$0xff]   ;;  %v4236_v2 = vld [vmem:[#allocation10 + $0x2d4] ss:$24 sps:$4 sm:$0xff]  }
 0x15a   :  { %v4667_v8 = vpop.eup %4666  ;;  %2843 = vmatpush1.bf16.msra.mxu1 %v4213_v47  ;;  %v4239_v4 = vld [vmem:[#allocation10 + $0x5d4] ss:$24 sps:$4 sm:$0xff]   ;;  %2809 = vmatprep.subr.bf16.mxu0 %v4236_v2  ;;  %v4699_v2 = vld [vmem:[#allocation5 + $0x10] sm:$0xff] }
 0x15b   :  { %v588_v9 = vsel %vm543_vm2, %v4667_v8, 0.0  ;;  %4670 = vpow2.f32 %v564_v6  ;;  %v582_v10 = vmul.f32 1.442695, %v579_v7  ;;  %v4669_v15 = vpop.eup %4668  ;;  %2844 = vmatprep.subr.bf16.mxu1 %v4221_v49  ;;  %v4234_v6 = vld [vmem:[#allocation10 + $0x2d0] ss:$24 sps:$4 sm:$0xff]   ;;  %v4696_v47 = vld [vmem:[#allocation5 + $0x28] sm:$0xff] }
 0x15c   :  { %v589_v11 = vrot.slane %v588_v9, 4  ;;  %v586_v23 = vmul.f32 %v4669_v15, %v584_v16  ;;  %v4237_v7 = vld [vmem:[#allocation10 + $0x5d0] ss:$24 sps:$4 sm:$0xff]   ;;  %2810 = vmatpush2.bf16.msra.mxu0 %v4234_v6  ;;  %v617_v48 = vunpack.c.l.bf16 %v4696_v47  ;;  %v618_v49 = vunpack.c.h.bf16 %v4696_v47 }
 0x15d   :  { %4672 = vpow2.f32 %v582_v10  ;;  %v4240_v10 = vld [vmem:[#allocation10 + $0x2a0] ss:$24 sps:$4 sm:$0xff]   ;;  %v4249_v16 = vld [vmem:[#allocation10 + $0x570] ss:$24 sps:$4 sm:$0xff]  }
 0x15e   :  { %v590_v12 = vadd.f32 %v589_v11, %v588_v9  ;;  %2845 = vmatpush1.bf16.msra.mxu1 %v4219_v51  ;;  %v4245_v9 = vld [vmem:[#allocation10 + $0x5a4] ss:$24 sps:$4 sm:$0xff]   ;;  %v4243_v11 = vld [vmem:[#allocation10 + $0x5a0] ss:$24 sps:$4 sm:$0xff]   ;;  %v607_v51 = vunpack.c.l.bf16 %v4697_v50 }
 0x15f   :  { %2846 = vmatprep.subr.bf16.mxu1 %v4227_v56  ;;  %v609_v56 = vunpack.c.l.bf16 %v4698_v55 }
 0x160   :  { %v591_v13 = vrot.slane %v590_v12, 2 }
 0x162   :  { %v592_v14 = vadd.f32 %v591_v13, %v590_v12  ;;  %2847 = vmatpush1.bf16.msra.mxu1 %v4225_v59  ;;  %v4248_v13 = vld [vmem:[#allocation10 + $0x274] ss:$24 sps:$4 sm:$0xff]  }
 0x163   :  { %2848 = vmatprep.subr.bf16.mxu1 %v4233_v61 }
 0x164   :  { %v593_v19 = vrot.slane %v592_v14, 1 }
 0x166   :  { %v594_v24 = vadd.f32 %v593_v19, %v592_v14  ;;  %2849 = vmatpush1.bf16.msra.mxu1 %v4231_v1  ;;  %v4251_v14 = vld [vmem:[#allocation10 + $0x574] ss:$24 sps:$4 sm:$0xff]   ;;  %v4252_v19 = vld [vmem:[#allocation10 + $0x240] ss:$24 sps:$4 sm:$0xff]  }
 0x167   :  { %2850 = vmatprep.subr.bf16.mxu1 %v4239_v4  ;;  %v611_v4 = vunpack.c.l.bf16 %v4699_v2 }
 0x168   :  { %v4671_v25 = vpop.eup %4670  ;;  %v602_v26 = vadd.f32 %v594_v24, %v586_v23  ;;  %v4263_v23 = vld [vmem:[#allocation10 + $0x514] ss:$24 sps:$4 sm:$0xff]   ;;  %v4258_v24 = vld [vmem:[#allocation10 + $0x210] ss:$24 sps:$4 sm:$0xff]  }
 0x169   :  { %726 = vperm.xlu0 %4171, %v4671_v25   ;;  %v587_v41 = vmul.f32 %v4671_v25, %v585_v39  ;;  %v4261_v25 = vld [vmem:[#allocation10 + $0x510] ss:$24 sps:$4 sm:$0xff]   ;;  %v4284_v39 = vld [vmem:[#allocation10 + $0x754] ss:$24 sps:$4 sm:$0xff]  }
 0x16a   :  { %v4673_v32 = vpop.eup %4672  ;;  %605 = vst.msk [vmem:[#allocation3] sm:$0x1] %vm113_vm0, %v602_v26  ;;  %2851 = vmatpush2.bf16.msra.mxu1 %v4237_v7  ;;  %v4266_v26 = vld [vmem:[#allocation10 + $0x1e4] ss:$24 sps:$4 sm:$0xff]  }
 0x16b   :  { %v595_v33 = vsel %vm543_vm2, %v4673_v32, 0.0  ;;  %626 = vperm.xlu1 %4170, %v4673_v32   ;;  %2852 = vmatprep.subr.bf16.mxu1 %v4245_v9  ;;  %v4275_v32 = vld [vmem:[#allocation10 + $0x4b4] ss:$24 sps:$4 sm:$0xff]   ;;  %v612_v9 = vunpack.c.h.bf16 %v4699_v2 }
 0x16c   :  { %v596_v34 = vrot.slane %v595_v33, 4 }
 0x16e   :  { %v597_v35 = vadd.f32 %v596_v34, %v595_v33  ;;  %2853 = vmatpush2.bf16.msra.mxu1 %v4243_v11  ;;  %v4270_v33 = vld [vmem:[#allocation10 + $0x1b0] ss:$24 sps:$4 sm:$0xff]  }
 0x16f   :  { %621 = vperm.xlu1 %4170, %v4667_v8   ;;  %v4242_v8 = vld [vmem:[#allocation10 + $0x2a4] ss:$24 sps:$4 sm:$0xff]   ;;  %2854 = vmatprep.subr.bf16.mxu1 %v4251_v14  ;;  %v4273_v34 = vld [vmem:[#allocation10 + $0x4b0] ss:$24 sps:$4 sm:$0xff]  }
 0x170   :  { %v598_v36 = vrot.slane %v597_v35, 2  ;;  %2811 = vmatprep.subr.bf16.mxu0 %v4242_v8 }
 0x171   :  { %v844_v37 = vld [vmem:[#allocation3] sm:$0x1]  ;;  %2812 = vmatpush2.bf16.msra.mxu0 %v4240_v10 }
 0x172   :  { %v599_v38 = vadd.f32 %v598_v36, %v597_v35  ;;  %4674 = vrcp.f32 %v844_v37  ;;  %2813 = vmatprep.subr.bf16.mxu0 %v4248_v13  ;;  %2855 = vmatpush2.bf16.msra.mxu1 %v4249_v16  ;;  %v4278_v35 = vld [vmem:[#allocation10 + $0x184] ss:$24 sps:$4 sm:$0xff]   ;;  %v4276_v37 = vld [vmem:[#allocation10 + $0x180] ss:$24 sps:$4 sm:$0xff]  }
 0x173   :  { %717 = vperm.xlu1 %4170, %v4669_v15   ;;  %v4246_v15 = vld [vmem:[#allocation10 + $0x270] ss:$24 sps:$4 sm:$0xff]   ;;  %2856 = vmatprep.subr.bf16.mxu1 %v4257_v18  ;;  %v4281_v36 = vld [vmem:[#allocation10 + $0x484] ss:$24 sps:$4 sm:$0xff]  }
 0x174   :  { %v600_v40 = vrot.slane %v599_v38, 1 }
 0x175   :  { %2814 = vmatpush2.bf16.msra.mxu0 %v4246_v15 }
 0x176   :  { %v601_v42 = vadd.f32 %v600_v40, %v599_v38  ;;  %2815 = vmatprep.subr.bf16.mxu0 %v4254_v17  ;;  %2857 = vmatpush2.bf16.msra.mxu1 %v4255_v20  ;;  %v4279_v38 = vld [vmem:[#allocation10 + $0x480] ss:$24 sps:$4 sm:$0xff]   ;;  %v4287_v40 = vld [vmem:[#allocation10 + $0x15c] ss:$24 sps:$4 sm:$0xff]  }
 0x177   :  { %2858 = vmatprep.subr.bf16.mxu1 %v4263_v23 }
 0x178   :  { %v603_v45 = vadd.f32 %v601_v42, %v587_v41  ;;  %v4694_v41 = vld [vmem:[#allocation5 + $0x18] sm:$0xff] }
 0x179   :  { %2816 = vmatpush2.bf16.msra.mxu0 %v4252_v19  ;;  %v613_v42 = vunpack.c.l.bf16 %v4694_v41  ;;  %v614_v43 = vunpack.c.h.bf16 %v4694_v41 }
 0x17a   :  { %606 = vst.msk [vmem:[#allocation3 + $0x1] sm:$0x1] %vm113_vm0, %v603_v45  ;;  %2817 = vmatprep.subr.bf16.mxu0 %v4260_v21  ;;  %2859 = vmatpush2.bf16.msra.mxu1 %v4261_v25  ;;  %v615_v45 = vunpack.c.l.bf16 %v4695_v44 }
 0x17b   :  { %2860 = vmatprep.subr.bf16.mxu1 %v4269_v28 }
 0x17d   :  { %2818 = vmatpush2.bf16.msra.mxu0 %v4258_v24 }
 0x17e   :  { %2819 = vmatprep.subr.bf16.mxu0 %v4266_v26  ;;  %2861 = vmatpush2.bf16.msra.mxu1 %v4267_v30 }
 0x17f   :  { %v4675_v52 = vpop.eup %4674  ;;  %2862 = vmatprep.subr.bf16.mxu1 %v4275_v32 }
 0x180   :  { %850 = vperm.xlu0 %4171, %v4675_v52   ;;  %v608_v52 = vunpack.c.h.bf16 %v4697_v50 }
 0x181   :  { %v845_v57 = vld [vmem:[#allocation3 + $0x1] sm:$0x1]  ;;  %2820 = vmatpush2.bf16.msra.mxu0 %v4264_v29 }
 0x182   :  { %4676 = vrcp.f32 %v845_v57  ;;  %2821 = vmatprep.subr.bf16.mxu0 %v4272_v31  ;;  %2863 = vmatpush2.bf16.msra.mxu1 %v4273_v34 }
 0x183   :  { %2864 = vmatprep.subr.bf16.mxu1 %v4281_v36 }
 0x184   :  { %3705 = vperm.xlu0 %4171, %v3703_v53  }
 0x185   :  { %2822 = vmatpush2.bf16.msra.mxu0 %v4270_v33 }
 0x186   :  { %2823 = vmatprep.subr.bf16.mxu0 %v4278_v35  ;;  %2865 = vmatpush2.bf16.msra.mxu1 %v4279_v38 }
 0x187   :  { %2916 = vmatprep.subr.bf16.mxu1 %v4287_v40 }
 0x189   :  { %2824 = vmatpush2.bf16.msra.mxu0 %v4276_v37 }
 0x18a   :  { %2875 = vmatprep.subr.bf16.mxu0 %v4284_v39 }
 0x18f   :  { %v4677_v12 = vpop.eup %4676 }
 0x190   :  { %859 = vperm.xlu1 %4170, %v4677_v12  }
 0x1e6   :  { %v627_v53 = vpop.permute.xlu1 %626 }
 0x1e7   :  { %v635_v57 = vmul.f32 %v627_v53, %v613_v42  ;;  %v636_v58 = vmul.f32 %v627_v53, %v614_v43  ;;  %v637_v59 = vmul.f32 %v627_v53, %v615_v45  ;;  %v638_v61 = vmul.f32 %v627_v53, %v616_v46 }
 0x1e8   :  { %v639_v63 = vmul.f32 %v627_v53, %v617_v48  ;;  %v640_v1 = vmul.f32 %v627_v53, %v618_v49 }
 0x1e9   :  { %v677_v6 = vrot.slane %v635_v57, 4  ;;  %v683_v7 = vrot.slane %v636_v58, 4  ;;  %v689_v8 = vrot.slane %v637_v59, 4  ;;  %v695_v10 = vrot.slane %v638_v61, 4 }
 0x1ea   :  { %v701_v11 = vrot.slane %v639_v63, 4  ;;  %v707_v12 = vrot.slane %v640_v1, 4  ;;  %v622_v13 = vpop.permute.xlu1 %621 }
 0x1eb   :  { %v678_v14 = vadd.f32 %v677_v6, %v635_v57  ;;  %v684_v15 = vadd.f32 %v683_v7, %v636_v58  ;;  %v690_v16 = vadd.f32 %v689_v8, %v637_v59  ;;  %v629_v17 = vmul.f32 %v622_v13, %v607_v51 }
 0x1ec   :  { %v696_v18 = vadd.f32 %v695_v10, %v638_v61  ;;  %v702_v19 = vadd.f32 %v701_v11, %v639_v63  ;;  %v708_v20 = vadd.f32 %v707_v12, %v640_v1  ;;  %v630_v21 = vmul.f32 %v622_v13, %v608_v52 }
 0x1ed   :  { %v679_v23 = vrot.slane %v678_v14, 2  ;;  %v685_v24 = vrot.slane %v684_v15, 2  ;;  %v691_v25 = vrot.slane %v690_v16, 2  ;;  %v631_v26 = vmul.f32 %v622_v13, %v609_v56 }
 0x1ee   :  { %v697_v28 = vrot.slane %v696_v18, 2  ;;  %v703_v29 = vrot.slane %v702_v19, 2  ;;  %v709_v30 = vrot.slane %v708_v20, 2  ;;  %v632_v31 = vmul.f32 %v622_v13, %v610_v60 }
 0x1ef   :  { %v680_v32 = vadd.f32 %v679_v23, %v678_v14  ;;  %v686_v33 = vadd.f32 %v685_v24, %v684_v15  ;;  %v692_v34 = vadd.f32 %v691_v25, %v690_v16  ;;  %v633_v35 = vmul.f32 %v622_v13, %v611_v4  ;;  %v727_v4 = vpop.permute.xlu0 %726  ;;  %v714_v23 = vld [vmem:[#allocation4 + $0x6] sm:$0x3f] }
 0x1f0   :  { %v698_v36 = vadd.f32 %v697_v28, %v696_v18  ;;  %v704_v37 = vadd.f32 %v703_v29, %v702_v19  ;;  %v710_v38 = vadd.f32 %v709_v30, %v708_v20  ;;  %v634_v39 = vmul.f32 %v622_v13, %v612_v9 }
 0x1f1   :  { %v681_v40 = vrot.slane %v680_v32, 1  ;;  %v687_v41 = vrot.slane %v686_v33, 1  ;;  %v693_v42 = vrot.slane %v692_v34, 1  ;;  %v641_v43 = vrot.slane %v629_v17, 4 }
 0x1f2   :  { %v699_v44 = vrot.slane %v698_v36, 1  ;;  %v705_v45 = vrot.slane %v704_v37, 1  ;;  %v711_v46 = vrot.slane %v710_v38, 1  ;;  %v647_v47 = vrot.slane %v630_v21, 4 }
 0x1f3   :  { %v682_v48 = vadd.f32 %v681_v40, %v680_v32  ;;  %v688_v49 = vadd.f32 %v687_v41, %v686_v33  ;;  %v694_v50 = vadd.f32 %v693_v42, %v692_v34  ;;  %v642_v51 = vadd.f32 %v641_v43, %v629_v17 }
 0x1f4   :  { %v700_v52 = vadd.f32 %v699_v44, %v698_v36  ;;  %v706_v53 = vadd.f32 %v705_v45, %v704_v37  ;;  %v712_v55 = vadd.f32 %v711_v46, %v710_v38  ;;  %v648_v56 = vadd.f32 %v647_v47, %v630_v21 }
 0x1f5   :  { %v787_v57 = vcombine.low %v682_v48, %v688_v49  ;;  %v643_v58 = vrot.slane %v642_v51, 2  ;;  %v653_v59 = vrot.slane %v631_v26, 4  ;;  %v659_v60 = vrot.slane %v632_v31, 4 }
 0x1f6   :  { %v788_v61 = vcombine.low %v694_v50, %v700_v52  ;;  %v789_v63 = vcombine.low %v706_v53, %v712_v55  ;;  %v649_v1 = vrot.slane %v648_v56, 2  ;;  %v665_v2 = vrot.slane %v633_v35, 4  ;;  %v718_v50 = vpop.permute.xlu1 %717 }
 0x1f7   :  { %v796_v6 = vrot.slane %v787_v57, %v4939_v5  ;;  %v644_v7 = vadd.f32 %v643_v58, %v642_v51  ;;  %v654_v8 = vadd.f32 %v653_v59, %v631_v26  ;;  %v660_v9 = vadd.f32 %v659_v60, %v632_v31  ;;  %v4700_v51 = vld [vmem:[%s5126_s0 + $0x6] sm:$0x3f] }
 0x1f8   :  { %v803_v10 = vrot.slane %v788_v61, %v4939_v5  ;;  %v810_v11 = vrot.slane %v789_v63, %v4939_v5  ;;  %v650_v12 = vadd.f32 %v649_v1, %v648_v56  ;;  %v666_v13 = vadd.f32 %v665_v2, %v633_v35  ;;  %v713_v60 = vld [vmem:[#allocation4] sm:$0x3f] }
 0x1f9   :  { %v645_v14 = vrot.slane %v644_v7, 1  ;;  %v655_v15 = vrot.slane %v654_v8, 2  ;;  %v661_v16 = vrot.slane %v660_v9, 2  ;;  %v671_v17 = vrot.slane %v634_v39, 4 }
 0x1fa   :  { %v732_v18 = vrot.slane %v727_v4, %v4958_v27  ;;  %v811_v19 = vcombine.low %v796_v6, %v803_v10  ;;  %v651_v20 = vrot.slane %v650_v12, 1  ;;  %v667_v21 = vrot.slane %v666_v13, 2  ;;  %v4701_v10 = vld [vmem:[%s5126_s0] sm:$0x3f]  ;;  %s4866_s0 = smov [#allocation16]  }
 0x1fb   :  { %v656_v24 = vadd.f32 %v655_v15, %v654_v8  ;;  %v662_v25 = vadd.f32 %v661_v16, %v660_v9  ;;  %v672_v26 = vadd.f32 %v671_v17, %v634_v39  ;;  %v646_v28 = vadd.f32 %v645_v14, %v644_v7  ;;  %s3723_s25 = sshll.u32 %s4866_s0, 4  ;;  %s3724_s25 = int_to_ptr.vmem [resolvable:$true] %s3723_s25 }
 0x1fc   :  { %v818_v29 = vrot.slane %v811_v19, %v4939_v5  ;;  %v825_v30 = vrot.slane %v810_v11, %v4939_v5  ;;  %v668_v31 = vadd.f32 %v667_v21, %v666_v13  ;;  %v652_v32 = vadd.f32 %v651_v20, %v650_v12  ;;  %s4822_s26 = scalar_lea.vmem %s3724_s25, 32  ;;  %p4827_p3 = scmp.lt.s32.totalorder %s3724_s25, %s3724_s25 }
 0x1fd   :  { %v657_v33 = vrot.slane %v656_v24, 1  ;;  %v663_v34 = vrot.slane %v662_v25, 1  ;;  %v673_v35 = vrot.slane %v672_v26, 2  ;;  %v734_v36 = vmul.f32 %v732_v18, %v714_v23  ;;  %v851_v23 = vpop.permute.xlu0 %850  ;;  %p4823_p2 = scmp.ne.s32.totalorder %s3724_s25, %s4822_s26  ;;  %p4828_p4 = scmp.lt.s32.totalorder %s4822_s26, %s4822_s26 }
 0x1fe   :  { %v826_v37 = vcombine.low %v818_v29, %v825_v30  ;;  %v669_v38 = vrot.slane %v668_v31, 1  ;;  %v747_v40 = vcombine.low %v646_v28, %v652_v32  ;;  %v870_v52 = vunpack.c.l.bf16 %v4700_v51 }
 0x1ff   :  { %v674_v41 = vadd.f32 %v673_v35, %v672_v26  ;;  %v658_v42 = vadd.f32 %v657_v33, %v656_v24  ;;  %v664_v43 = vadd.f32 %v663_v34, %v662_v25  ;;  %v871_v53 = vunpack.c.h.bf16 %v4700_v51  ;;  %p4829_p5 = por %p4828_p4, %p4827_p3 }
 0x200   :  { %v830_v44 = vadd.f32 %v826_v37, %v734_v36  ;;  %v670_v45 = vadd.f32 %v669_v38, %v668_v31  ;;  %v756_v47 = vrot.slane %v747_v40, %v4939_v5  ;;  %v723_v59 = vrot.slane %v718_v50, %v4958_v27 }
 0x201   :  { %v675_v39 = vrot.slane %v674_v41, 1  ;;  %v748_v46 = vcombine.low %v658_v42, %v664_v43  ;;  %v897_v61 = vrot.slane %v870_v52, %v4939_v5  ;;  %v904_v63 = vrot.slane %v871_v53, %v4939_v5  ;;  %p4830_p6 = pnand %p4829_p5, %p4823_p2 }
 0x202   :  { %836 = vst.msk [vmem:[#allocation4 + $0x6] sm:$0x3f] %vm4974_vm1, %v830_v44  ;;  %v733_v4 = vmul.f32 %v723_v59, %v713_v60  ;;  %v868_v11 = vunpack.c.l.bf16 %v4701_v10  ;;  %v869_v12 = vunpack.c.h.bf16 %v4701_v10  ;;  %v5021_v15 = vsub.s32 3, %v4936_v3 }
 0x203   :  { %v676_v48 = vadd.f32 %v675_v39, %v674_v41  ;;  %v763_v49 = vrot.slane %v748_v46, %v4939_v5  ;;  %v905_v7 = vcombine.low %v897_v61, %v904_v63  ;;  %v5024_v16 = vsub.s32 2, %v4936_v3 }
 0x204   :  { %v5029_v17 = vsub.s32 5, %v4936_v3  ;;  %v5032_v18 = vsub.s32 4, %v4936_v3  ;;  %v882_v20 = vrot.slane %v868_v11, %v4939_v5  ;;  %v889_v21 = vrot.slane %v869_v12, %v4939_v5 }
 0x205   :  { %v749_v55 = vcombine.low %v670_v45, %v676_v48  ;;  %v771_v56 = vcombine.low %v756_v47, %v763_v49 }
 0x206   :  { %v890_v33 = vcombine.low %v882_v20, %v889_v21  ;;  %v4282_v20 = vld [vmem:[#allocation10 + $0x750] ss:$24 sps:$4 sm:$0xff]  }
 0x207   :  { %v770_v57 = vrot.slane %v749_v55, %v4939_v5  ;;  %v778_v58 = vrot.slane %v771_v56, %v4939_v5  ;;  %v4285_v21 = vld [vmem:[#allocation10 + $0x158] ss:$24 sps:$4 sm:$0xff]  }
 0x209   :  { %v785_v1 = vrot.slane %v770_v57, %v4939_v5  ;;  %v843_v13 = vld [vmem:[#allocation4 + $0x6] sm:$0x3f]  ;;  %v856_v5 = vrot.slane %v851_v23, %v4958_v27 }
 0x20b   :  { %v786_v2 = vcombine.low %v778_v58, %v785_v1  ;;  %v860_v6 = vpop.permute.xlu1 %859 }
 0x20c   :  { %v865_v8 = vrot.slane %v860_v6, %v4958_v27 }
 0x20d   :  { %v829_v9 = vadd.f32 %v786_v2, %v733_v4 }
 0x20e   :  { %v867_v14 = vmul.f32 %v865_v8, %v843_v13 }
 0x20f   :  { %835 = vst.msk [vmem:[#allocation4] sm:$0x3f] %vm4974_vm1, %v829_v9 }
 0x210   :  { %v909_v19 = vadd.f32 %v905_v7, %v867_v14 }
 0x212   :  { %v943_v24 = vrot.slane %v909_v19, %v4953_v22  ;;  %v951_v25 = vrot.slane %v909_v19, %v5021_v15  ;;  %v939_v26 = vrot.slane %v909_v19, %v4958_v27  ;;  %v947_v62 = vrot.slane %v909_v19, %v5024_v16 }
 0x213   :  { %v959_v28 = vrot.slane %v909_v19, %v5029_v17  ;;  %v955_v29 = vrot.slane %v909_v19, %v5032_v18 }
 0x214   :  { %v979_v3 = vpack.c.bf16 %v943_v24, %v943_v24  ;;  %v981_v30 = vpack.c.bf16 %v951_v25, %v951_v25  ;;  %v978_v31 = vpack.c.bf16 %v939_v26, %v939_v26  ;;  %v980_v32 = vpack.c.bf16 %v947_v62, %v947_v62  ;;  %v4290_v62 = vld [vmem:[#allocation10 + $0x724] ss:$24 sps:$4 sm:$0xff]  }
 0x215   :  { %v983_v37 = vpack.c.bf16 %v959_v28, %v959_v28  ;;  %v982_v38 = vpack.c.bf16 %v955_v29, %v955_v29  ;;  %v4293_v28 = vld [vmem:[#allocation10 + $0x12c] ss:$24 sps:$4 sm:$0xff]  }
 0x216   :  { %v842_v34 = vld [vmem:[#allocation4] sm:$0x3f]  ;;  %v1323_v35 = vunpack.c.l.b16 %v979_v3  ;;  %v1325_v36 = vunpack.c.l.b16 %v981_v30  ;;  %v1322_v41 = vunpack.c.l.b16 %v978_v31  ;;  %v1324_v42 = vunpack.c.l.b16 %v980_v32  ;;  %v4296_v31 = vld [vmem:[#allocation10 + $0x6f4] ss:$24 sps:$4 sm:$0xff]  }
 0x217   :  { %v866_v40 = vmul.f32 %v856_v5, %v842_v34  ;;  %v1327_v39 = vunpack.c.l.b16 %v983_v37  ;;  %v1326_v46 = vunpack.c.l.b16 %v982_v38  ;;  %v4288_v3 = vld [vmem:[#allocation10 + $0x720] ss:$24 sps:$4 sm:$0xff]   ;;  %v4299_v32 = vld [vmem:[#allocation10 + $0xfc] ss:$24 sps:$4 sm:$0xff]  }
 0x218   :  { %v1331_v44 = vrot.slane %v1323_v35, 7  ;;  %v1335_v45 = vrot.slane %v1325_v36, 7  ;;  %v1328_v51 = vrot.slane %v1322_v41, 7  ;;  %v1333_v52 = vrot.slane %v1324_v42, 7  ;;  %v4291_v30 = vld [vmem:[#allocation10 + $0x128] ss:$24 sps:$4 sm:$0xff]  }
 0x219   :  { %v908_v43 = vadd.f32 %v890_v33, %v866_v40  ;;  %v1339_v61 = vrot.slane %v1327_v39, 7  ;;  %v1337_v1 = vrot.slane %v1326_v46, 7  ;;  %v4294_v33 = vld [vmem:[#allocation10 + $0x6f0] ss:$24 sps:$4 sm:$0xff]   ;;  %v4302_v34 = vld [vmem:[#allocation10 + $0x6c4] ss:$24 sps:$4 sm:$0xff]  }
 0x21a   :  { %v4297_v5 = vld [vmem:[#allocation10 + $0xf8] ss:$24 sps:$4 sm:$0xff]   ;;  %v4305_v35 = vld [vmem:[#allocation10 + $0xcc] ss:$24 sps:$4 sm:$0xff]   ;;  %v4303_v37 = vld [vmem:[#allocation10 + $0xc8] ss:$24 sps:$4 sm:$0xff]  }
 0x21b   :  { %v919_v47 = vrot.slane %v908_v43, %v4953_v22  ;;  %v927_v48 = vrot.slane %v908_v43, %v5021_v15  ;;  %v915_v49 = vrot.slane %v908_v43, %v4958_v27  ;;  %v923_v50 = vrot.slane %v908_v43, %v5024_v16  ;;  %v4300_v36 = vld [vmem:[#allocation10 + $0x6c0] ss:$24 sps:$4 sm:$0xff]   ;;  %v4308_v38 = vld [vmem:[#allocation10 + $0x694] ss:$24 sps:$4 sm:$0xff]   ;;  %v4306_v41 = vld [vmem:[#allocation10 + $0x690] ss:$24 sps:$4 sm:$0xff]  }
 0x21c   :  { %v935_v53 = vrot.slane %v908_v43, %v5029_v17  ;;  %v931_v55 = vrot.slane %v908_v43, %v5032_v18  ;;  %v4311_v40 = vld [vmem:[#allocation10 + $0x9c] ss:$24 sps:$4 sm:$0xff]   ;;  %v4309_v42 = vld [vmem:[#allocation10 + $0x98] ss:$24 sps:$4 sm:$0xff]   ;;  %v4315_v39 = vld [vmem:[#allocation10 + $0x68] ss:$24 sps:$4 sm:$0xff]  }
 0x21d   :  { %v973_v56 = vpack.c.bf16 %v919_v47, %v919_v47  ;;  %v975_v57 = vpack.c.bf16 %v927_v48, %v927_v48  ;;  %v972_v58 = vpack.c.bf16 %v915_v49, %v915_v49  ;;  %v974_v59 = vpack.c.bf16 %v923_v50, %v923_v50  ;;  %v4314_v43 = vld [vmem:[#allocation10 + $0x664] ss:$24 sps:$4 sm:$0xff]   ;;  %v4320_v46 = vld [vmem:[#allocation10 + $0x634] ss:$24 sps:$4 sm:$0xff]   ;;  %v4318_v48 = vld [vmem:[#allocation10 + $0x630] ss:$24 sps:$4 sm:$0xff]  }
 0x21e   :  { %v977_v60 = vpack.c.bf16 %v935_v53, %v935_v53  ;;  %v976_v63 = vpack.c.bf16 %v931_v55, %v931_v55  ;;  %v4323_v47 = vld [vmem:[#allocation10 + $0x3c] ss:$24 sps:$4 sm:$0xff]   ;;  %v4321_v49 = vld [vmem:[#allocation10 + $0x38] ss:$24 sps:$4 sm:$0xff]   ;;  %v4327_v53 = vld [vmem:[#allocation10 + $0x8] ss:$24 sps:$4 sm:$0xff]  }
 0x21f   :  { %v1317_v2 = vunpack.c.l.b16 %v973_v56  ;;  %v1319_v4 = vunpack.c.l.b16 %v975_v57  ;;  %v1316_v6 = vunpack.c.l.b16 %v972_v58  ;;  %v1318_v7 = vunpack.c.l.b16 %v974_v59  ;;  %v4326_v50 = vld [vmem:[#allocation10 + $0x604] ss:$24 sps:$4 sm:$0xff]   ;;  %v4332_v55 = vld [vmem:[#allocation10 + $0x8d4] ss:$24 sps:$4 sm:$0xff]   ;;  %v4330_v57 = vld [vmem:[#allocation10 + $0x8d0] ss:$24 sps:$4 sm:$0xff]  }
 0x220   :  { %v1321_v8 = vunpack.c.l.b16 %v977_v60  ;;  %v1320_v9 = vunpack.c.l.b16 %v976_v63  ;;  %v4335_v56 = vld [vmem:[#allocation10 + $0x2dc] ss:$24 sps:$4 sm:$0xff]   ;;  %v4333_v58 = vld [vmem:[#allocation10 + $0x2d8] ss:$24 sps:$4 sm:$0xff]   ;;  %v4341_v60 = vld [vmem:[#allocation10 + $0x2ac] ss:$24 sps:$4 sm:$0xff]  }
 0x221   :  { %v1332_v10 = vsel %vm1329_vm3, %v1331_v44, %v1317_v2  ;;  %v1336_v11 = vsel %vm1329_vm3, %v1335_v45, %v1319_v4  ;;  %v1330_v12 = vsel %vm1329_vm3, %v1328_v51, %v1316_v6  ;;  %v1334_v13 = vsel %vm1329_vm3, %v1333_v52, %v1318_v7  ;;  %v4317_v44 = vld [vmem:[#allocation10 + $0x6c] ss:$24 sps:$4 sm:$0xff]   ;;  %v4312_v45 = vld [vmem:[#allocation10 + $0x660] ss:$24 sps:$4 sm:$0xff]   ;;  %v4347_v2 = vld [vmem:[#allocation10 + $0x27c] ss:$24 sps:$4 sm:$0xff]  }
 0x222   :  { %v5053_v14 = vpack.c.b16 %v1332_v10, %v1332_v10  ;;  %v5055_v19 = vpack.c.b16 %v1336_v11, %v1336_v11  ;;  %v5057_v23 = vpack.c.b16 %v1330_v12, %v1330_v12  ;;  %v5059_v24 = vpack.c.b16 %v1334_v13, %v1334_v13  ;;  %v4329_v51 = vld [vmem:[#allocation10 + $0xc] ss:$24 sps:$4 sm:$0xff]   ;;  %v4324_v52 = vld [vmem:[#allocation10 + $0x600] ss:$24 sps:$4 sm:$0xff]   ;;  %v4342_v4 = vld [vmem:[#allocation10 + $0x870] ss:$24 sps:$4 sm:$0xff]  }
 0x223   :  { %v1340_v25 = vsel %vm1329_vm3, %v1339_v61, %v1321_v8  ;;  %v5063_v26 = vsel %vm1329_vm3, %v1337_v1, %v1320_v9  ;;  %v4338_v59 = vld [vmem:[#allocation10 + $0x8a4] ss:$24 sps:$4 sm:$0xff]   ;;  %v4336_v61 = vld [vmem:[#allocation10 + $0x8a0] ss:$24 sps:$4 sm:$0xff]   ;;  %v4344_v1 = vld [vmem:[#allocation10 + $0x874] ss:$24 sps:$4 sm:$0xff]  }
 0x224   :  { %2825 = vmatprep.mubr.bf16.mxu0 %v5053_v14  ;;  %2866 = vmatprep.mubr.bf16.mxu1 %v5055_v19  ;;  %v5069_v29 = vpack.c.b16 %v1340_v25, %v1340_v25  ;;  %v4339_v63 = vld [vmem:[#allocation10 + $0x2a8] ss:$24 sps:$4 sm:$0xff]   ;;  %v4345_v6 = vld [vmem:[#allocation10 + $0x278] ss:$24 sps:$4 sm:$0xff]   ;;  %v4350_v7 = vld [vmem:[#allocation10 + $0x844] ss:$24 sps:$4 sm:$0xff]  }
 0x225   :  { %2826 = vmatmul.mubr.bf16.vlgmr.msra.gmra.mxu0 %v5057_v23  ;;  %2867 = vmatmul.mubr.bf16.vlgmr.msra.gmra.mxu1 %v5059_v24  ;;  %v4353_v8 = vld [vmem:[#allocation10 + $0x24c] ss:$24 sps:$4 sm:$0xff]   ;;  %v4348_v9 = vld [vmem:[#allocation10 + $0x840] ss:$24 sps:$4 sm:$0xff]   ;;  %v4359_v12 = vld [vmem:[#allocation10 + $0x21c] ss:$24 sps:$4 sm:$0xff]  }
 0x226   :  { %2876 = vmatpush1.bf16.msra.mxu0 %v4282_v20  ;;  %2917 = vmatpush1.bf16.msra.mxu1 %v4285_v21  ;;  %v4351_v10 = vld [vmem:[#allocation10 + $0x248] ss:$24 sps:$4 sm:$0xff]   ;;  %v4356_v11 = vld [vmem:[#allocation10 + $0x814] ss:$24 sps:$4 sm:$0xff]   ;;  %v4357_v20 = vld [vmem:[#allocation10 + $0x218] ss:$24 sps:$4 sm:$0xff]  }
 0x227   :  { %2907 = vmatprep.mubr.bf16.mxu0 %v5069_v29  ;;  %2948 = vmatprep.mubr.bf16.mxu1 %v5053_v14  ;;  %v4354_v13 = vld [vmem:[#allocation10 + $0x810] ss:$24 sps:$4 sm:$0xff]   ;;  %v4362_v21 = vld [vmem:[#allocation10 + $0x7e4] ss:$24 sps:$4 sm:$0xff]  }
 0x228   :  { %2877 = vmatprep.subr.bf16.mxu0 %v4290_v62  ;;  %2918 = vmatprep.subr.bf16.mxu1 %v4293_v28  ;;  %v4365_v25 = vld [vmem:[#allocation10 + $0x1ec] ss:$24 sps:$4 sm:$0xff]   ;;  %v4360_v62 = vld [vmem:[#allocation10 + $0x7e0] ss:$24 sps:$4 sm:$0xff]  }
 0x229   :  { %v4363_v28 = vld [vmem:[#allocation10 + $0x1e8] ss:$24 sps:$4 sm:$0xff]  }
 0x22a   :  { %2878 = vmatpush1.bf16.msra.mxu0 %v4288_v3  ;;  %2919 = vmatpush1.bf16.msra.mxu1 %v4291_v30  ;;  %v4368_v3 = vld [vmem:[#allocation10 + $0x7b4] ss:$24 sps:$4 sm:$0xff]  }
 0x22b   :  { %2879 = vmatprep.subr.bf16.mxu0 %v4296_v31  ;;  %2920 = vmatprep.subr.bf16.mxu1 %v4299_v32  ;;  %v4371_v30 = vld [vmem:[#allocation10 + $0x1bc] ss:$24 sps:$4 sm:$0xff]   ;;  %v4366_v31 = vld [vmem:[#allocation10 + $0x7b0] ss:$24 sps:$4 sm:$0xff]  }
 0x22c   :  { %v4369_v32 = vld [vmem:[#allocation10 + $0x1b8] ss:$24 sps:$4 sm:$0xff]  }
 0x22e   :  { %2880 = vmatpush1.bf16.msra.mxu0 %v4294_v33  ;;  %2921 = vmatpush1.bf16.msra.mxu1 %v4297_v5  ;;  %v4374_v33 = vld [vmem:[#allocation10 + $0x784] ss:$24 sps:$4 sm:$0xff]  }
 0x22f   :  { %2881 = vmatprep.subr.bf16.mxu0 %v4302_v34  ;;  %2922 = vmatprep.subr.bf16.mxu1 %v4305_v35  ;;  %v4377_v5 = vld [vmem:[#allocation10 + $0x18c] ss:$24 sps:$4 sm:$0xff]   ;;  %v4372_v34 = vld [vmem:[#allocation10 + $0x780] ss:$24 sps:$4 sm:$0xff]  }
 0x230   :  { %v4375_v35 = vld [vmem:[#allocation10 + $0x188] ss:$24 sps:$4 sm:$0xff]  }
 0x232   :  { %2882 = vmatpush1.bf16.msra.mxu0 %v4300_v36  ;;  %2923 = vmatpush1.bf16.msra.mxu1 %v4303_v37  ;;  %v4380_v36 = vld [vmem:[#allocation10 + $0x45c] ss:$24 sps:$4 sm:$0xff]  }
 0x233   :  { %2883 = vmatprep.subr.bf16.mxu0 %v4308_v38  ;;  %2924 = vmatprep.subr.bf16.mxu1 %v4311_v40  ;;  %v4383_v37 = vld [vmem:[#allocation10 + $0x75c] ss:$24 sps:$4 sm:$0xff]   ;;  %v4378_v38 = vld [vmem:[#allocation10 + $0x458] ss:$24 sps:$4 sm:$0xff]   ;;  %v5075_v40 = vpack.c.b16 %v5063_v26, %v5063_v26 }
 0x234   :  { %v4395_v26 = vld [vmem:[#allocation10 + $0x6fc] ss:$24 sps:$4 sm:$0xff]  }
 0x236   :  { %2884 = vmatpush1.bf16.msra.mxu0 %v4306_v41  ;;  %2925 = vmatpush1.bf16.msra.mxu1 %v4309_v42  ;;  %v4381_v41 = vld [vmem:[#allocation10 + $0x758] ss:$24 sps:$4 sm:$0xff]   ;;  %v4386_v42 = vld [vmem:[#allocation10 + $0x42c] ss:$24 sps:$4 sm:$0xff]  }
 0x237   :  { %2885 = vmatprep.subr.bf16.mxu0 %v4314_v43  ;;  %2926 = vmatprep.subr.bf16.mxu1 %v4317_v44  ;;  %v4389_v43 = vld [vmem:[#allocation10 + $0x72c] ss:$24 sps:$4 sm:$0xff]   ;;  %v4384_v44 = vld [vmem:[#allocation10 + $0x428] ss:$24 sps:$4 sm:$0xff]  }
 0x23a   :  { %2886 = vmatpush1.bf16.msra.mxu0 %v4312_v45  ;;  %2927 = vmatpush1.bf16.msra.mxu1 %v4315_v39  ;;  %v4387_v45 = vld [vmem:[#allocation10 + $0x728] ss:$24 sps:$4 sm:$0xff]   ;;  %v4392_v39 = vld [vmem:[#allocation10 + $0x3fc] ss:$24 sps:$4 sm:$0xff]  }
 0x23b   :  { %2887 = vmatprep.subr.bf16.mxu0 %v4320_v46  ;;  %2928 = vmatprep.subr.bf16.mxu1 %v4323_v47  ;;  %v4390_v46 = vld [vmem:[#allocation10 + $0x3f8] ss:$24 sps:$4 sm:$0xff]  }
 0x23c   :  { %v4393_v47 = vld [vmem:[#allocation10 + $0x6f8] ss:$24 sps:$4 sm:$0xff]  }
 0x23e   :  { %2888 = vmatpush1.bf16.msra.mxu0 %v4318_v48  ;;  %2929 = vmatpush1.bf16.msra.mxu1 %v4321_v49  ;;  %v4398_v48 = vld [vmem:[#allocation10 + $0x3cc] ss:$24 sps:$4 sm:$0xff]  }
 0x23f   :  { %2889 = vmatprep.subr.bf16.mxu0 %v4326_v50  ;;  %2930 = vmatprep.subr.bf16.mxu1 %v4329_v51  ;;  %v4401_v49 = vld [vmem:[#allocation10 + $0x6cc] ss:$24 sps:$4 sm:$0xff]   ;;  %v4396_v50 = vld [vmem:[#allocation10 + $0x3c8] ss:$24 sps:$4 sm:$0xff]  }
 0x240   :  { %v4399_v51 = vld [vmem:[#allocation10 + $0x6c8] ss:$24 sps:$4 sm:$0xff]  }
 0x242   :  { %2890 = vmatpush1.bf16.msra.mxu0 %v4324_v52  ;;  %2931 = vmatpush1.bf16.msra.mxu1 %v4327_v53  ;;  %v4404_v52 = vld [vmem:[#allocation10 + $0x39c] ss:$24 sps:$4 sm:$0xff]  }
 0x243   :  { %2891 = vmatprep.subr.bf16.mxu0 %v4332_v55  ;;  %2932 = vmatprep.subr.bf16.mxu1 %v4335_v56  ;;  %v4407_v53 = vld [vmem:[#allocation10 + $0x69c] ss:$24 sps:$4 sm:$0xff]   ;;  %v4402_v55 = vld [vmem:[#allocation10 + $0x398] ss:$24 sps:$4 sm:$0xff]  }
 0x244   :  { %v4405_v56 = vld [vmem:[#allocation10 + $0x698] ss:$24 sps:$4 sm:$0xff]  }
 0x246   :  { %2892 = vmatpush2.bf16.msra.mxu0 %v4330_v57  ;;  %2933 = vmatpush2.bf16.msra.mxu1 %v4333_v58  ;;  %v4410_v57 = vld [vmem:[#allocation10 + $0x36c] ss:$24 sps:$4 sm:$0xff]  }
 0x247   :  { %2893 = vmatprep.subr.bf16.mxu0 %v4338_v59  ;;  %2934 = vmatprep.subr.bf16.mxu1 %v4341_v60  ;;  %v4413_v58 = vld [vmem:[#allocation10 + $0x66c] ss:$24 sps:$4 sm:$0xff]   ;;  %v4408_v59 = vld [vmem:[#allocation10 + $0x368] ss:$24 sps:$4 sm:$0xff]  }
 0x248   :  { %v4411_v60 = vld [vmem:[#allocation10 + $0x668] ss:$24 sps:$4 sm:$0xff]  }
 0x24a   :  { %2894 = vmatpush2.bf16.msra.mxu0 %v4336_v61  ;;  %2935 = vmatpush2.bf16.msra.mxu1 %v4339_v63  ;;  %v4416_v61 = vld [vmem:[#allocation10 + $0x33c] ss:$24 sps:$4 sm:$0xff]  }
 0x24b   :  { %2895 = vmatprep.subr.bf16.mxu0 %v4344_v1  ;;  %2936 = vmatprep.subr.bf16.mxu1 %v4347_v2  ;;  %v4419_v63 = vld [vmem:[#allocation10 + $0x63c] ss:$24 sps:$4 sm:$0xff]   ;;  %v4414_v1 = vld [vmem:[#allocation10 + $0x338] ss:$24 sps:$4 sm:$0xff]  }
 0x24c   :  { %v4417_v2 = vld [vmem:[#allocation10 + $0x638] ss:$24 sps:$4 sm:$0xff]  }
 0x24e   :  { %2896 = vmatpush2.bf16.msra.mxu0 %v4342_v4  ;;  %2937 = vmatpush2.bf16.msra.mxu1 %v4345_v6  ;;  %v4422_v4 = vld [vmem:[#allocation10 + $0x30c] ss:$24 sps:$4 sm:$0xff]  }
 0x24f   :  { %2897 = vmatprep.subr.bf16.mxu0 %v4350_v7  ;;  %2938 = vmatprep.subr.bf16.mxu1 %v4353_v8  ;;  %v4425_v6 = vld [vmem:[#allocation10 + $0x60c] ss:$24 sps:$4 sm:$0xff]   ;;  %v4420_v7 = vld [vmem:[#allocation10 + $0x308] ss:$24 sps:$4 sm:$0xff]  }
 0x250   :  { %v4423_v8 = vld [vmem:[#allocation10 + $0x608] ss:$24 sps:$4 sm:$0xff]  }
 0x252   :  { %2898 = vmatpush2.bf16.msra.mxu0 %v4348_v9  ;;  %2939 = vmatpush2.bf16.msra.mxu1 %v4351_v10  ;;  %v4428_v9 = vld [vmem:[#allocation10 + $0x5dc] ss:$24 sps:$4 sm:$0xff]  }
 0x253   :  { %2899 = vmatprep.subr.bf16.mxu0 %v4356_v11  ;;  %2940 = vmatprep.subr.bf16.mxu1 %v4359_v12  ;;  %v4431_v10 = vld [vmem:[#allocation10 + $0x8dc] ss:$24 sps:$4 sm:$0xff]   ;;  %v4426_v11 = vld [vmem:[#allocation10 + $0x5d8] ss:$24 sps:$4 sm:$0xff]  }
 0x254   :  { %v4429_v12 = vld [vmem:[#allocation10 + $0x8d8] ss:$24 sps:$4 sm:$0xff]  }
 0x256   :  { %2900 = vmatpush2.bf16.msra.mxu0 %v4354_v13  ;;  %2941 = vmatpush2.bf16.msra.mxu1 %v4357_v20  ;;  %v4434_v13 = vld [vmem:[#allocation10 + $0x5ac] ss:$24 sps:$4 sm:$0xff]  }
 0x257   :  { %2901 = vmatprep.subr.bf16.mxu0 %v4362_v21  ;;  %2942 = vmatprep.subr.bf16.mxu1 %v4365_v25  ;;  %v4437_v20 = vld [vmem:[#allocation10 + $0x8ac] ss:$24 sps:$4 sm:$0xff]   ;;  %v4432_v21 = vld [vmem:[#allocation10 + $0x5a8] ss:$24 sps:$4 sm:$0xff]  }
 0x258   :  { %v4435_v25 = vld [vmem:[#allocation10 + $0x8a8] ss:$24 sps:$4 sm:$0xff]  }
 0x25a   :  { %2902 = vmatpush2.bf16.msra.mxu0 %v4360_v62  ;;  %2943 = vmatpush2.bf16.msra.mxu1 %v4363_v28  ;;  %v4440_v62 = vld [vmem:[#allocation10 + $0x57c] ss:$24 sps:$4 sm:$0xff]  }
 0x25b   :  { %2903 = vmatprep.subr.bf16.mxu0 %v4368_v3  ;;  %2944 = vmatprep.subr.bf16.mxu1 %v4371_v30  ;;  %v4443_v28 = vld [vmem:[#allocation10 + $0x87c] ss:$24 sps:$4 sm:$0xff]   ;;  %v4438_v3 = vld [vmem:[#allocation10 + $0x578] ss:$24 sps:$4 sm:$0xff]  }
 0x25c   :  { %v4441_v30 = vld [vmem:[#allocation10 + $0x878] ss:$24 sps:$4 sm:$0xff]  }
 0x25e   :  { %2904 = vmatpush2.bf16.msra.mxu0 %v4366_v31  ;;  %2945 = vmatpush2.bf16.msra.mxu1 %v4369_v32  ;;  %v4446_v31 = vld [vmem:[#allocation10 + $0x54c] ss:$24 sps:$4 sm:$0xff]  }
 0x25f   :  { %2905 = vmatprep.subr.bf16.mxu0 %v4374_v33  ;;  %2946 = vmatprep.subr.bf16.mxu1 %v4377_v5  ;;  %v4449_v32 = vld [vmem:[#allocation10 + $0x84c] ss:$24 sps:$4 sm:$0xff]   ;;  %v4444_v33 = vld [vmem:[#allocation10 + $0x548] ss:$24 sps:$4 sm:$0xff]  }
 0x260   :  { %v4447_v5 = vld [vmem:[#allocation10 + $0x848] ss:$24 sps:$4 sm:$0xff]  }
 0x262   :  { %2906 = vmatpush2.bf16.msra.mxu0 %v4372_v34  ;;  %2947 = vmatpush2.bf16.msra.mxu1 %v4375_v35  ;;  %v4452_v34 = vld [vmem:[#allocation10 + $0x51c] ss:$24 sps:$4 sm:$0xff]  }
 0x263   :  { %2957 = vmatprep.subr.bf16.mxu0 %v4380_v36  ;;  %2998 = vmatprep.subr.bf16.mxu1 %v4383_v37  ;;  %v4455_v35 = vld [vmem:[#allocation10 + $0x81c] ss:$24 sps:$4 sm:$0xff]   ;;  %v4450_v36 = vld [vmem:[#allocation10 + $0x518] ss:$24 sps:$4 sm:$0xff]  }
 0x264   :  { %v4453_v37 = vld [vmem:[#allocation10 + $0x818] ss:$24 sps:$4 sm:$0xff]  }
 0x265   :  { %2908 = vmatmul.mubr.bf16.vlgmr.msra.gmra.mxu0 %v5075_v40  ;;  %2949 = vmatmul.mubr.bf16.vlgmr.msra.gmra.mxu1 %v5057_v23 }
 0x266   :  { %2958 = vmatpush1.bf16.msra.mxu0 %v4378_v38  ;;  %2989 = vmatprep.mubr.bf16.mxu0 %v5055_v19  ;;  %v4458_v38 = vld [vmem:[#allocation10 + $0x4ec] ss:$24 sps:$4 sm:$0xff]  }
 0x267   :  { %2999 = vmatpush1.bf16.msra.mxu1 %v4381_v41  ;;  %3030 = vmatprep.mubr.bf16.mxu1 %v5069_v29  ;;  %v4461_v41 = vld [vmem:[#allocation10 + $0x7ec] ss:$24 sps:$4 sm:$0xff]  }
 0x268   :  { %2959 = vmatprep.subr.bf16.mxu0 %v4386_v42  ;;  %3000 = vmatprep.subr.bf16.mxu1 %v4389_v43  ;;  %v4456_v42 = vld [vmem:[#allocation10 + $0x4e8] ss:$24 sps:$4 sm:$0xff]  }
 0x269   :  { %v4459_v43 = vld [vmem:[#allocation10 + $0x7e8] ss:$24 sps:$4 sm:$0xff]  }
 0x26a   :  { %2960 = vmatpush1.bf16.msra.mxu0 %v4384_v44  ;;  %v4464_v44 = vld [vmem:[#allocation10 + $0x4bc] ss:$24 sps:$4 sm:$0xff]  }
 0x26b   :  { %3001 = vmatpush1.bf16.msra.mxu1 %v4387_v45  ;;  %2961 = vmatprep.subr.bf16.mxu0 %v4392_v39  ;;  %v4467_v45 = vld [vmem:[#allocation10 + $0x7bc] ss:$24 sps:$4 sm:$0xff]   ;;  %v4462_v39 = vld [vmem:[#allocation10 + $0x4b8] ss:$24 sps:$4 sm:$0xff]  }
 0x26c   :  { %3002 = vmatprep.subr.bf16.mxu1 %v4395_v26  ;;  %v4465_v26 = vld [vmem:[#allocation10 + $0x7b8] ss:$24 sps:$4 sm:$0xff]  }
 0x26e   :  { %2962 = vmatpush1.bf16.msra.mxu0 %v4390_v46  ;;  %v4470_v46 = vld [vmem:[#allocation10 + $0x48c] ss:$24 sps:$4 sm:$0xff]  }
 0x26f   :  { %3003 = vmatpush1.bf16.msra.mxu1 %v4393_v47  ;;  %2963 = vmatprep.subr.bf16.mxu0 %v4398_v48  ;;  %v4473_v47 = vld [vmem:[#allocation10 + $0x78c] ss:$24 sps:$4 sm:$0xff]   ;;  %v4468_v48 = vld [vmem:[#allocation10 + $0x488] ss:$24 sps:$4 sm:$0xff]  }
 0x270   :  { %3004 = vmatprep.subr.bf16.mxu1 %v4401_v49  ;;  %v4471_v49 = vld [vmem:[#allocation10 + $0x788] ss:$24 sps:$4 sm:$0xff]  }
 0x272   :  { %2964 = vmatpush1.bf16.msra.mxu0 %v4396_v50  ;;  %v4476_v50 = vld [vmem:[#allocation10 + $0x164] ss:$24 sps:$4 sm:$0xff]  }
 0x273   :  { %3005 = vmatpush1.bf16.msra.mxu1 %v4399_v51  ;;  %2965 = vmatprep.subr.bf16.mxu0 %v4404_v52  ;;  %v4479_v51 = vld [vmem:[#allocation10 + $0x464] ss:$24 sps:$4 sm:$0xff]   ;;  %v4474_v52 = vld [vmem:[#allocation10 + $0x160] ss:$24 sps:$4 sm:$0xff]  }
 0x274   :  { %3006 = vmatprep.subr.bf16.mxu1 %v4407_v53  ;;  %v4477_v53 = vld [vmem:[#allocation10 + $0x460] ss:$24 sps:$4 sm:$0xff]  }
 0x276   :  { %2966 = vmatpush1.bf16.msra.mxu0 %v4402_v55  ;;  %v4482_v55 = vld [vmem:[#allocation10 + $0x134] ss:$24 sps:$4 sm:$0xff]  }
 0x277   :  { %3007 = vmatpush1.bf16.msra.mxu1 %v4405_v56  ;;  %2967 = vmatprep.subr.bf16.mxu0 %v4410_v57  ;;  %v4485_v56 = vld [vmem:[#allocation10 + $0x434] ss:$24 sps:$4 sm:$0xff]   ;;  %v4480_v57 = vld [vmem:[#allocation10 + $0x130] ss:$24 sps:$4 sm:$0xff]  }
 0x278   :  { %3008 = vmatprep.subr.bf16.mxu1 %v4413_v58  ;;  %v4483_v58 = vld [vmem:[#allocation10 + $0x430] ss:$24 sps:$4 sm:$0xff]  }
 0x27a   :  { %2968 = vmatpush1.bf16.msra.mxu0 %v4408_v59  ;;  %v4488_v59 = vld [vmem:[#allocation10 + $0x104] ss:$24 sps:$4 sm:$0xff]  }
 0x27b   :  { %3009 = vmatpush1.bf16.msra.mxu1 %v4411_v60  ;;  %2969 = vmatprep.subr.bf16.mxu0 %v4416_v61  ;;  %v4491_v60 = vld [vmem:[#allocation10 + $0x404] ss:$24 sps:$4 sm:$0xff]   ;;  %v4486_v61 = vld [vmem:[#allocation10 + $0x100] ss:$24 sps:$4 sm:$0xff]  }
 0x27c   :  { %3010 = vmatprep.subr.bf16.mxu1 %v4419_v63  ;;  %v4489_v63 = vld [vmem:[#allocation10 + $0x400] ss:$24 sps:$4 sm:$0xff]  }
 0x27e   :  { %2970 = vmatpush1.bf16.msra.mxu0 %v4414_v1  ;;  %v4494_v1 = vld [vmem:[#allocation10 + $0xd4] ss:$24 sps:$4 sm:$0xff]  }
 0x27f   :  { %3011 = vmatpush1.bf16.msra.mxu1 %v4417_v2  ;;  %2971 = vmatprep.subr.bf16.mxu0 %v4422_v4  ;;  %v4497_v2 = vld [vmem:[#allocation10 + $0x3d4] ss:$24 sps:$4 sm:$0xff]   ;;  %v4492_v4 = vld [vmem:[#allocation10 + $0xd0] ss:$24 sps:$4 sm:$0xff]  }
 0x280   :  { %3012 = vmatprep.subr.bf16.mxu1 %v4425_v6  ;;  %v4500_v6 = vld [vmem:[#allocation10 + $0xa4] ss:$24 sps:$4 sm:$0xff]  }
 0x282   :  { %2972 = vmatpush1.bf16.msra.mxu0 %v4420_v7  ;;  %v4503_v7 = vld [vmem:[#allocation10 + $0x3a4] ss:$24 sps:$4 sm:$0xff]  }
 0x283   :  { %3013 = vmatpush1.bf16.msra.mxu1 %v4423_v8  ;;  %2973 = vmatprep.subr.bf16.mxu0 %v4428_v9  ;;  %v4501_v8 = vld [vmem:[#allocation10 + $0x3a0] ss:$24 sps:$4 sm:$0xff]   ;;  %v4506_v9 = vld [vmem:[#allocation10 + $0x74] ss:$24 sps:$4 sm:$0xff]  }
 0x284   :  { %3014 = vmatprep.subr.bf16.mxu1 %v4431_v10  ;;  %v4509_v10 = vld [vmem:[#allocation10 + $0x374] ss:$24 sps:$4 sm:$0xff]  }
 0x286   :  { %2974 = vmatpush2.bf16.msra.mxu0 %v4426_v11  ;;  %v4504_v11 = vld [vmem:[#allocation10 + $0x70] ss:$24 sps:$4 sm:$0xff]  }
 0x287   :  { %3015 = vmatpush2.bf16.msra.mxu1 %v4429_v12  ;;  %2975 = vmatprep.subr.bf16.mxu0 %v4434_v13  ;;  %v4507_v12 = vld [vmem:[#allocation10 + $0x370] ss:$24 sps:$4 sm:$0xff]   ;;  %v4512_v13 = vld [vmem:[#allocation10 + $0x44] ss:$24 sps:$4 sm:$0xff]  }
 0x288   :  { %3016 = vmatprep.subr.bf16.mxu1 %v4437_v20  ;;  %v4515_v20 = vld [vmem:[#allocation10 + $0x344] ss:$24 sps:$4 sm:$0xff]  }
 0x28a   :  { %2976 = vmatpush2.bf16.msra.mxu0 %v4432_v21  ;;  %v4510_v21 = vld [vmem:[#allocation10 + $0x40] ss:$24 sps:$4 sm:$0xff]  }
 0x28b   :  { %3017 = vmatpush2.bf16.msra.mxu1 %v4435_v25  ;;  %2977 = vmatprep.subr.bf16.mxu0 %v4440_v62  ;;  %v4513_v25 = vld [vmem:[#allocation10 + $0x340] ss:$24 sps:$4 sm:$0xff]   ;;  %v4518_v62 = vld [vmem:[#allocation10 + $0x14] ss:$24 sps:$4 sm:$0xff]  }
 0x28c   :  { %3018 = vmatprep.subr.bf16.mxu1 %v4443_v28  ;;  %v4521_v28 = vld [vmem:[#allocation10 + $0x314] ss:$24 sps:$4 sm:$0xff]  }
 0x28e   :  { %2978 = vmatpush2.bf16.msra.mxu0 %v4438_v3  ;;  %v4516_v3 = vld [vmem:[#allocation10 + $0x10] ss:$24 sps:$4 sm:$0xff]  }
 0x28f   :  { %3019 = vmatpush2.bf16.msra.mxu1 %v4441_v30  ;;  %2979 = vmatprep.subr.bf16.mxu0 %v4446_v31  ;;  %v4519_v30 = vld [vmem:[#allocation10 + $0x310] ss:$24 sps:$4 sm:$0xff]   ;;  %v4524_v31 = vld [vmem:[#allocation10 + $0x2e4] ss:$24 sps:$4 sm:$0xff]  }
 0x290   :  { %3020 = vmatprep.subr.bf16.mxu1 %v4449_v32  ;;  %v4527_v32 = vld [vmem:[#allocation10 + $0x5e4] ss:$24 sps:$4 sm:$0xff]  }
 0x292   :  { %2980 = vmatpush2.bf16.msra.mxu0 %v4444_v33  ;;  %v4522_v33 = vld [vmem:[#allocation10 + $0x2e0] ss:$24 sps:$4 sm:$0xff]  }
 0x293   :  { %3021 = vmatpush2.bf16.msra.mxu1 %v4447_v5  ;;  %2981 = vmatprep.subr.bf16.mxu0 %v4452_v34  ;;  %v4525_v5 = vld [vmem:[#allocation10 + $0x5e0] ss:$24 sps:$4 sm:$0xff]   ;;  %v4530_v34 = vld [vmem:[#allocation10 + $0x2b4] ss:$24 sps:$4 sm:$0xff]  }
 0x294   :  { %3022 = vmatprep.subr.bf16.mxu1 %v4455_v35  ;;  %v4533_v35 = vld [vmem:[#allocation10 + $0x5b4] ss:$24 sps:$4 sm:$0xff]  }
 0x296   :  { %2982 = vmatpush2.bf16.msra.mxu0 %v4450_v36  ;;  %v4528_v36 = vld [vmem:[#allocation10 + $0x2b0] ss:$24 sps:$4 sm:$0xff]  }
 0x297   :  { %3023 = vmatpush2.bf16.msra.mxu1 %v4453_v37  ;;  %2983 = vmatprep.subr.bf16.mxu0 %v4458_v38  ;;  %v4531_v37 = vld [vmem:[#allocation10 + $0x5b0] ss:$24 sps:$4 sm:$0xff]   ;;  %v4536_v38 = vld [vmem:[#allocation10 + $0x284] ss:$24 sps:$4 sm:$0xff]  }
 0x298   :  { %3024 = vmatprep.subr.bf16.mxu1 %v4461_v41  ;;  %v4539_v41 = vld [vmem:[#allocation10 + $0x584] ss:$24 sps:$4 sm:$0xff]  }
 0x29a   :  { %2984 = vmatpush2.bf16.msra.mxu0 %v4456_v42  ;;  %v4534_v42 = vld [vmem:[#allocation10 + $0x280] ss:$24 sps:$4 sm:$0xff]  }
 0x29b   :  { %3025 = vmatpush2.bf16.msra.mxu1 %v4459_v43  ;;  %2985 = vmatprep.subr.bf16.mxu0 %v4464_v44  ;;  %v4537_v43 = vld [vmem:[#allocation10 + $0x580] ss:$24 sps:$4 sm:$0xff]   ;;  %v4542_v44 = vld [vmem:[#allocation10 + $0x254] ss:$24 sps:$4 sm:$0xff]  }
 0x29c   :  { %3026 = vmatprep.subr.bf16.mxu1 %v4467_v45  ;;  %v4545_v45 = vld [vmem:[#allocation10 + $0x554] ss:$24 sps:$4 sm:$0xff]  }
 0x29e   :  { %2986 = vmatpush2.bf16.msra.mxu0 %v4462_v39  ;;  %v4540_v39 = vld [vmem:[#allocation10 + $0x250] ss:$24 sps:$4 sm:$0xff]  }
 0x29f   :  { %3027 = vmatpush2.bf16.msra.mxu1 %v4465_v26  ;;  %2987 = vmatprep.subr.bf16.mxu0 %v4470_v46  ;;  %v4543_v26 = vld [vmem:[#allocation10 + $0x550] ss:$24 sps:$4 sm:$0xff]   ;;  %v4548_v46 = vld [vmem:[#allocation10 + $0x224] ss:$24 sps:$4 sm:$0xff]  }
 0x2a0   :  { %3028 = vmatprep.subr.bf16.mxu1 %v4473_v47  ;;  %v4551_v47 = vld [vmem:[#allocation10 + $0x524] ss:$24 sps:$4 sm:$0xff]  }
 0x2a2   :  { %2988 = vmatpush2.bf16.msra.mxu0 %v4468_v48  ;;  %v4546_v48 = vld [vmem:[#allocation10 + $0x220] ss:$24 sps:$4 sm:$0xff]  }
 0x2a3   :  { %3029 = vmatpush2.bf16.msra.mxu1 %v4471_v49  ;;  %3039 = vmatprep.subr.bf16.mxu0 %v4476_v50  ;;  %v4549_v49 = vld [vmem:[#allocation10 + $0x520] ss:$24 sps:$4 sm:$0xff]   ;;  %v4554_v50 = vld [vmem:[#allocation10 + $0x1f4] ss:$24 sps:$4 sm:$0xff]  }
 0x2a4   :  { %3080 = vmatprep.subr.bf16.mxu1 %v4479_v51  ;;  %v4557_v51 = vld [vmem:[#allocation10 + $0x4f4] ss:$24 sps:$4 sm:$0xff]  }
 0x2a5   :  { %2990 = vmatmul.mubr.bf16.vlgmr.msra.gmra.mxu0 %v5059_v24 }
 0x2a6   :  { %3031 = vmatmul.mubr.bf16.vlgmr.msra.gmra.mxu1 %v5075_v40  ;;  %3040 = vmatpush1.bf16.msra.mxu0 %v4474_v52  ;;  %v4552_v52 = vld [vmem:[#allocation10 + $0x1f0] ss:$24 sps:$4 sm:$0xff]  }
 0x2a7   :  { %3071 = vmatprep.mubr.bf16.mxu0 %v5053_v14  ;;  %3081 = vmatpush1.bf16.msra.mxu1 %v4477_v53  ;;  %v4495_v14 = vld [vmem:[#allocation10 + $0x3d0] ss:$24 sps:$4 sm:$0xff]  }
 0x2a8   :  { %3112 = vmatprep.mubr.bf16.mxu1 %v5055_v19  ;;  %3041 = vmatprep.subr.bf16.mxu0 %v4482_v55  ;;  %v4498_v19 = vld [vmem:[#allocation10 + $0xa0] ss:$24 sps:$4 sm:$0xff]   ;;  %v4555_v53 = vld [vmem:[#allocation10 + $0x4f0] ss:$24 sps:$4 sm:$0xff]   ;;  %v4560_v55 = vld [vmem:[#allocation10 + $0x1c4] ss:$24 sps:$4 sm:$0xff]  }
 0x2a9   :  { %3082 = vmatprep.subr.bf16.mxu1 %v4485_v56  ;;  %v4563_v56 = vld [vmem:[#allocation10 + $0x4c4] ss:$24 sps:$4 sm:$0xff]  }
 0x2aa   :  { %3042 = vmatpush1.bf16.msra.mxu0 %v4480_v57  ;;  %v4558_v57 = vld [vmem:[#allocation10 + $0x1c0] ss:$24 sps:$4 sm:$0xff]  }
 0x2ab   :  { %3083 = vmatpush1.bf16.msra.mxu1 %v4483_v58  ;;  %3043 = vmatprep.subr.bf16.mxu0 %v4488_v59  ;;  %v4561_v58 = vld [vmem:[#allocation10 + $0x4c0] ss:$24 sps:$4 sm:$0xff]   ;;  %v4566_v59 = vld [vmem:[#allocation10 + $0x194] ss:$24 sps:$4 sm:$0xff]  }
 0x2ac   :  { %3084 = vmatprep.subr.bf16.mxu1 %v4491_v60  ;;  %v4569_v60 = vld [vmem:[#allocation10 + $0x494] ss:$24 sps:$4 sm:$0xff]  }
 0x2ae   :  { %3044 = vmatpush1.bf16.msra.mxu0 %v4486_v61  ;;  %v4564_v61 = vld [vmem:[#allocation10 + $0x190] ss:$24 sps:$4 sm:$0xff]  }
 0x2af   :  { %3085 = vmatpush1.bf16.msra.mxu1 %v4489_v63  ;;  %3045 = vmatprep.subr.bf16.mxu0 %v4494_v1  ;;  %v4567_v63 = vld [vmem:[#allocation10 + $0x490] ss:$24 sps:$4 sm:$0xff]   ;;  %v4572_v1 = vld [vmem:[#allocation10 + $0x764] ss:$24 sps:$4 sm:$0xff]  }
 0x2b0   :  { %3086 = vmatprep.subr.bf16.mxu1 %v4497_v2  ;;  %v4612_v2 = vld [vmem:[#allocation13 + $0x78] sm:$0xff]  }
 0x2b2   :  { %3046 = vmatpush1.bf16.msra.mxu0 %v4492_v4  ;;  %v4570_v4 = vld [vmem:[#allocation10 + $0x760] ss:$24 sps:$4 sm:$0xff]  }
 0x2b3   :  { %3087 = vmatpush1.bf16.msra.mxu1 %v4495_v14  ;;  %3047 = vmatprep.subr.bf16.mxu0 %v4500_v6  ;;  %v4575_v14 = vld [vmem:[#allocation10 + $0x734] ss:$24 sps:$4 sm:$0xff]   ;;  %v4613_v6 = vld [vmem:[#allocation13 + $0x38] sm:$0xff]  }
 0x2b4   :  { %3088 = vmatprep.subr.bf16.mxu1 %v4503_v7 }
 0x2b6   :  { %3048 = vmatpush1.bf16.msra.mxu0 %v4498_v19 }
 0x2b7   :  { %3089 = vmatpush1.bf16.msra.mxu1 %v4501_v8  ;;  %3049 = vmatprep.subr.bf16.mxu0 %v4506_v9  ;;  %v4617_v8 = vld [vmem:[#allocation13 + $0x70] sm:$0xff]   ;;  %v4573_v9 = vld [vmem:[#allocation10 + $0x730] ss:$24 sps:$4 sm:$0xff]  }
 0x2b8   :  { %3090 = vmatprep.subr.bf16.mxu1 %v4509_v10 }
 0x2ba   :  { %3050 = vmatpush1.bf16.msra.mxu0 %v4504_v11 }
 0x2bb   :  { %3091 = vmatpush1.bf16.msra.mxu1 %v4507_v12  ;;  %3051 = vmatprep.subr.bf16.mxu0 %v4512_v13  ;;  %v4578_v12 = vld [vmem:[#allocation10 + $0x704] ss:$24 sps:$4 sm:$0xff]  }
 0x2bc   :  { %3092 = vmatprep.subr.bf16.mxu1 %v4515_v20  ;;  %v4618_v13 = vld [vmem:[#allocation13 + $0x30] sm:$0xff]  }
 0x2be   :  { %3052 = vmatpush1.bf16.msra.mxu0 %v4510_v21  ;;  %v4622_v21 = vld [vmem:[#allocation13 + $0x68] sm:$0xff]  }
 0x2bf   :  { %3093 = vmatpush1.bf16.msra.mxu1 %v4513_v25  ;;  %3053 = vmatprep.subr.bf16.mxu0 %v4518_v62  ;;  %v4576_v25 = vld [vmem:[#allocation10 + $0x700] ss:$24 sps:$4 sm:$0xff]  }
 0x2c0   :  { %3094 = vmatprep.subr.bf16.mxu1 %v4521_v28  ;;  %v4581_v28 = vld [vmem:[#allocation10 + $0x6d4] ss:$24 sps:$4 sm:$0xff]  }
 0x2c2   :  { %3054 = vmatpush1.bf16.msra.mxu0 %v4516_v3  ;;  %v4624_v3 = vld [vmem:[#allocation13 + $0x60] sm:$0xff]  }
 0x2c3   :  { %3095 = vmatpush1.bf16.msra.mxu1 %v4519_v30  ;;  %3055 = vmatprep.subr.bf16.mxu0 %v4524_v31  ;;  %v4579_v30 = vld [vmem:[#allocation10 + $0x6d0] ss:$24 sps:$4 sm:$0xff]   ;;  %v4584_v31 = vld [vmem:[#allocation10 + $0x6a4] ss:$24 sps:$4 sm:$0xff]  }
 0x2c4   :  { %3096 = vmatprep.subr.bf16.mxu1 %v4527_v32  ;;  %v4625_v32 = vld [vmem:[#allocation13 + $0x20] sm:$0xff]  }
 0x2c6   :  { %3056 = vmatpush2.bf16.msra.mxu0 %v4522_v33  ;;  %v4626_v33 = vld [vmem:[#allocation13 + $0x58] sm:$0xff]  }
 0x2c7   :  { %3097 = vmatpush2.bf16.msra.mxu1 %v4525_v5  ;;  %3057 = vmatprep.subr.bf16.mxu0 %v4530_v34  ;;  %v4582_v5 = vld [vmem:[#allocation10 + $0x6a0] ss:$24 sps:$4 sm:$0xff]   ;;  %v4587_v34 = vld [vmem:[#allocation10 + $0x674] ss:$24 sps:$4 sm:$0xff]  }
 0x2c8   :  { %3098 = vmatprep.subr.bf16.mxu1 %v4533_v35  ;;  %v4627_v35 = vld [vmem:[#allocation13 + $0x18] sm:$0xff]  }
 0x2ca   :  { %3058 = vmatpush2.bf16.msra.mxu0 %v4528_v36  ;;  %v4628_v36 = vld [vmem:[#allocation13 + $0x50] sm:$0xff]  }
 0x2cb   :  { %3099 = vmatpush2.bf16.msra.mxu1 %v4531_v37  ;;  %3059 = vmatprep.subr.bf16.mxu0 %v4536_v38  ;;  %v4585_v37 = vld [vmem:[#allocation10 + $0x670] ss:$24 sps:$4 sm:$0xff]   ;;  %v4590_v38 = vld [vmem:[#allocation10 + $0x644] ss:$24 sps:$4 sm:$0xff]  }
 0x2cc   :  { %3100 = vmatprep.subr.bf16.mxu1 %v4539_v41  ;;  %v4629_v41 = vld [vmem:[#allocation13 + $0x10] sm:$0xff]  }
 0x2ce   :  { %3060 = vmatpush2.bf16.msra.mxu0 %v4534_v42  ;;  %v4630_v42 = vld [vmem:[#allocation13 + $0x48] sm:$0xff]  }
 0x2cf   :  { %3101 = vmatpush2.bf16.msra.mxu1 %v4537_v43  ;;  %3061 = vmatprep.subr.bf16.mxu0 %v4542_v44  ;;  %v4588_v43 = vld [vmem:[#allocation10 + $0x640] ss:$24 sps:$4 sm:$0xff]   ;;  %v4593_v44 = vld [vmem:[#allocation10 + $0x614] ss:$24 sps:$4 sm:$0xff]  }
 0x2d0   :  { %3102 = vmatprep.subr.bf16.mxu1 %v4545_v45  ;;  %v4631_v45 = vld [vmem:[#allocation13 + $0x8] sm:$0xff]  }
 0x2d2   :  { %3062 = vmatpush2.bf16.msra.mxu0 %v4540_v39  ;;  %v4632_v39 = vld [vmem:[#allocation13 + $0x40] sm:$0xff]  }
 0x2d3   :  { %3103 = vmatpush2.bf16.msra.mxu1 %v4543_v26  ;;  %3063 = vmatprep.subr.bf16.mxu0 %v4548_v46  ;;  %v4591_v26 = vld [vmem:[#allocation10 + $0x610] ss:$24 sps:$4 sm:$0xff]   ;;  %v4596_v46 = vld [vmem:[#allocation10 + $0x8e4] ss:$24 sps:$4 sm:$0xff]  }
 0x2d4   :  { %3104 = vmatprep.subr.bf16.mxu1 %v4551_v47  ;;  %v4633_v47 = vld [vmem:[#allocation13] sm:$0xff]  }
 0x2d6   :  { %3064 = vmatpush2.bf16.msra.mxu0 %v4546_v48  ;;  %v4634_v48 = vld [vmem:[#allocation13 + $0xf8] sm:$0xff]  }
 0x2d7   :  { %3105 = vmatpush2.bf16.msra.mxu1 %v4549_v49  ;;  %3065 = vmatprep.subr.bf16.mxu0 %v4554_v50  ;;  %v4594_v49 = vld [vmem:[#allocation10 + $0x8e0] ss:$24 sps:$4 sm:$0xff]   ;;  %v4599_v50 = vld [vmem:[#allocation10 + $0x8b4] ss:$24 sps:$4 sm:$0xff]  }
 0x2d8   :  { %3106 = vmatprep.subr.bf16.mxu1 %v4557_v51  ;;  %v4597_v51 = vld [vmem:[#allocation10 + $0x8b0] ss:$24 sps:$4 sm:$0xff]  }
 0x2da   :  { %3066 = vmatpush2.bf16.msra.mxu0 %v4552_v52  ;;  %v4602_v52 = vld [vmem:[#allocation10 + $0x884] ss:$24 sps:$4 sm:$0xff]  }
 0x2db   :  { %3107 = vmatpush2.bf16.msra.mxu1 %v4555_v53  ;;  %3067 = vmatprep.subr.bf16.mxu0 %v4560_v55  ;;  %v4600_v53 = vld [vmem:[#allocation10 + $0x880] ss:$24 sps:$4 sm:$0xff]   ;;  %v4605_v55 = vld [vmem:[#allocation10 + $0x854] ss:$24 sps:$4 sm:$0xff]  }
 0x2dc   :  { %3108 = vmatprep.subr.bf16.mxu1 %v4563_v56  ;;  %v4603_v56 = vld [vmem:[#allocation10 + $0x850] ss:$24 sps:$4 sm:$0xff]  }
 0x2de   :  { %3068 = vmatpush2.bf16.msra.mxu0 %v4558_v57  ;;  %v4608_v57 = vld [vmem:[#allocation10 + $0x824] ss:$24 sps:$4 sm:$0xff]  }
 0x2df   :  { %3109 = vmatpush2.bf16.msra.mxu1 %v4561_v58  ;;  %3069 = vmatprep.subr.bf16.mxu0 %v4566_v59  ;;  %v4606_v58 = vld [vmem:[#allocation10 + $0x820] ss:$24 sps:$4 sm:$0xff]   ;;  %v4611_v59 = vld [vmem:[#allocation10 + $0x7f4] ss:$24 sps:$4 sm:$0xff]  }
 0x2e0   :  { %3110 = vmatprep.subr.bf16.mxu1 %v4569_v60  ;;  %v4609_v60 = vld [vmem:[#allocation10 + $0x7f0] ss:$24 sps:$4 sm:$0xff]  }
 0x2e2   :  { %3070 = vmatpush2.bf16.msra.mxu0 %v4564_v61  ;;  %v4616_v61 = vld [vmem:[#allocation10 + $0x7c4] ss:$24 sps:$4 sm:$0xff]  }
 0x2e3   :  { %3111 = vmatpush2.bf16.msra.mxu1 %v4567_v63  ;;  %3121 = vmatprep.subr.bf16.mxu0 %v4572_v1  ;;  %v5096_v63 = vld [vmem:[#allocation11] sm:$0x3f] }
 0x2e4   :  { %4089 = vmatprep.subr.bf16.mxu1 %v4612_v2  ;;  %v4614_v1 = vld [vmem:[#allocation10 + $0x7c0] ss:$24 sps:$4 sm:$0xff]   ;;  %v4621_v2 = vld [vmem:[#allocation10 + $0x794] ss:$24 sps:$4 sm:$0xff]  }
 0x2e5   :  { %3072 = vmatmul.mubr.bf16.vlgmr.msra.gmra.mxu0 %v5057_v23  ;;  %v5086_v7 = vpop.f32.mrf.mxu0  ;;  %v5088_v19 = vpop.f32.mrf.mxu1 }
 0x2e6   :  { %3113 = vmatmul.mubr.bf16.vlgmr.msra.gmra.mxu1 %v5059_v24  ;;  %3122 = vmatpush1.bf16.msra.mxu0 %v4570_v4  ;;  %v1277_v4 = vrot.slane %v5096_v63, %v4958_v27 }
 0x2e7   :  { %3153 = vmatprep.mubr.bf16.mxu0 %v5069_v29  ;;  %v5092_v10 = vpop.f32.mrf.mxu0  ;;  %v5094_v11 = vpop.f32.mrf.mxu1  ;;  %3123 = vmatprep.subr.bf16.mxu0 %v4575_v14  ;;  %v4623_v29 = vld [vmem:[#allocation13 + $0x28] sm:$0xff]   ;;  %v1281_v14 = vrot.slane %v5096_v63, %v4953_v22 }
 0x2e8   :  { %4090 = vmatpush3.bf16.msra.mxu1 %v4613_v6  ;;  %v4619_v6 = vld [vmem:[#allocation10 + $0x790] ss:$24 sps:$4 sm:$0xff]  }
 0x2e9   :  { %v2831_v23 = vpop.f32.mrf.mxu0  ;;  %v2872_v20 = vpop.f32.mrf.mxu1  ;;  %4091 = vmatprep.subr.bf16.mxu1 %v4617_v8  ;;  %v2828_v8 = vadd.f32 %v5086_v7, %v1277_v4 }
 0x2ea   :  { %3124 = vmatpush1.bf16.msra.mxu0 %v4573_v9  ;;  %v2830_v9 = vadd.f32 %v5092_v10, %v1281_v14 }
 0x2eb   :  { %v2832_v62 = vpop.f32.mrf.mxu0  ;;  %v2873_v24 = vpop.f32.mrf.mxu1  ;;  %3125 = vmatprep.subr.bf16.mxu0 %v4578_v12  ;;  %v2869_v12 = vadd.f32 %v5088_v19, %v2828_v8  ;;  %v4652_v19 = vld [vmem:[#allocation13 + $0x170] sm:$0xff]  }
 0x2ec   :  { %4092 = vmatpush3.bf16.msra.mxu1 %v4618_v13  ;;  %v2871_v27 = vadd.f32 %v5094_v11, %v2830_v9  ;;  %v4655_v11 = vld [vmem:[#allocation13 + $0x128] sm:$0xff]   ;;  %v4660_v8 = vld [vmem:[#allocation13 + $0x150] sm:$0xff]  }
 0x2ed   :  { %4093 = vmatprep.subr.bf16.mxu1 %v4622_v21  ;;  %v4661_v9 = vld [vmem:[#allocation13 + $0x110] sm:$0xff]  }
 0x2ee   :  { %3126 = vmatpush1.bf16.msra.mxu0 %v4576_v25 }
 0x2ef   :  { %3127 = vmatprep.subr.bf16.mxu0 %v4581_v28  ;;  %v4650_v28 = vld [vmem:[#allocation13 + $0x178] sm:$0xff]  }
 0x2f0   :  { %4094 = vmatpush3.bf16.msra.mxu1 %v4623_v29  ;;  %v4651_v29 = vld [vmem:[#allocation13 + $0x138] sm:$0xff]  }
 0x2f1   :  { %4095 = vmatprep.subr.bf16.mxu1 %v4624_v3  ;;  %v4653_v3 = vld [vmem:[#allocation13 + $0x130] sm:$0xff]  }
 0x2f2   :  { %3128 = vmatpush1.bf16.msra.mxu0 %v4579_v30 }
 0x2f3   :  { %3129 = vmatprep.subr.bf16.mxu0 %v4584_v31 }
 0x2f4   :  { %4096 = vmatpush3.bf16.msra.mxu1 %v4625_v32 }
 0x2f5   :  { %4097 = vmatprep.subr.bf16.mxu1 %v4626_v33  ;;  %v4635_v33 = vld [vmem:[#allocation13 + $0xb8] sm:$0xff]  }
 0x2f6   :  { %3130 = vmatpush1.bf16.msra.mxu0 %v4582_v5 }
 0x2f7   :  { %3131 = vmatprep.subr.bf16.mxu0 %v4587_v34  ;;  %v4636_v34 = vld [vmem:[#allocation13 + $0xf0] sm:$0xff]  }
 0x2f8   :  { %4098 = vmatpush3.bf16.msra.mxu1 %v4627_v35  ;;  %v4637_v35 = vld [vmem:[#allocation13 + $0xb0] sm:$0xff]  }
 0x2f9   :  { %4099 = vmatprep.subr.bf16.mxu1 %v4628_v36  ;;  %v4638_v36 = vld [vmem:[#allocation13 + $0xe8] sm:$0xff]  }
 0x2fa   :  { %3132 = vmatpush1.bf16.msra.mxu0 %v4585_v37  ;;  %v4639_v37 = vld [vmem:[#allocation13 + $0xa8] sm:$0xff]  }
 0x2fb   :  { %3133 = vmatprep.subr.bf16.mxu0 %v4590_v38  ;;  %v4640_v38 = vld [vmem:[#allocation13 + $0xe0] sm:$0xff]  }
 0x2fc   :  { %4100 = vmatpush3.bf16.msra.mxu1 %v4629_v41  ;;  %v4641_v41 = vld [vmem:[#allocation13 + $0xa0] sm:$0xff]  }
 0x2fd   :  { %4101 = vmatprep.subr.bf16.mxu1 %v4630_v42  ;;  %v4642_v42 = vld [vmem:[#allocation13 + $0xd8] sm:$0xff]  }
 0x2fe   :  { %3134 = vmatpush1.bf16.msra.mxu0 %v4588_v43  ;;  %v4643_v43 = vld [vmem:[#allocation13 + $0x98] sm:$0xff]  }
 0x2ff   :  { %3135 = vmatprep.subr.bf16.mxu0 %v4593_v44  ;;  %v4644_v44 = vld [vmem:[#allocation13 + $0xd0] sm:$0xff]  }
 0x300   :  { %4102 = vmatpush3.bf16.msra.mxu1 %v4631_v45  ;;  %v4645_v45 = vld [vmem:[#allocation13 + $0x90] sm:$0xff]  }
 0x301   :  { %4103 = vmatprep.subr.bf16.mxu1 %v4632_v39  ;;  %v4646_v39 = vld [vmem:[#allocation13 + $0xc8] sm:$0xff]  }
 0x302   :  { %3136 = vmatpush1.bf16.msra.mxu0 %v4591_v26  ;;  %v4647_v26 = vld [vmem:[#allocation13 + $0x88] sm:$0xff]  }
 0x303   :  { %3137 = vmatprep.subr.bf16.mxu0 %v4596_v46  ;;  %v4648_v46 = vld [vmem:[#allocation13 + $0xc0] sm:$0xff]  }
 0x304   :  { %4104 = vmatpush3.bf16.msra.mxu1 %v4633_v47  ;;  %v4649_v47 = vld [vmem:[#allocation13 + $0x80] sm:$0xff]  }
 0x305   :  { %4111 = vmatprep.subr.bf16.mxu1 %v4634_v48  ;;  %v1285_v48 = vrot.slane %v5096_v63, %v5024_v16  ;;  %v4657_v16 = vld [vmem:[#allocation13 + $0x120] sm:$0xff]  }
 0x306   :  { %3138 = vmatpush2.bf16.msra.mxu0 %v4594_v49  ;;  %v1289_v49 = vrot.slane %v5096_v63, %v5021_v15  ;;  %v4658_v15 = vld [vmem:[#allocation13 + $0x158] sm:$0xff]  }
 0x307   :  { %3139 = vmatprep.subr.bf16.mxu0 %v4599_v50 }
 0x30a   :  { %3140 = vmatpush2.bf16.msra.mxu0 %v4597_v51 }
 0x30b   :  { %3141 = vmatprep.subr.bf16.mxu0 %v4602_v52 }
 0x30e   :  { %3142 = vmatpush2.bf16.msra.mxu0 %v4600_v53 }
 0x30f   :  { %3143 = vmatprep.subr.bf16.mxu0 %v4605_v55 }
 0x312   :  { %3144 = vmatpush2.bf16.msra.mxu0 %v4603_v56 }
 0x313   :  { %3145 = vmatprep.subr.bf16.mxu0 %v4608_v57 }
 0x316   :  { %3146 = vmatpush2.bf16.msra.mxu0 %v4606_v58 }
 0x317   :  { %3147 = vmatprep.subr.bf16.mxu0 %v4611_v59 }
 0x31a   :  { %3148 = vmatpush2.bf16.msra.mxu0 %v4609_v60 }
 0x31b   :  { %3149 = vmatprep.subr.bf16.mxu0 %v4616_v61 }
 0x31e   :  { %3150 = vmatpush2.bf16.msra.mxu0 %v4614_v1 }
 0x31f   :  { %3151 = vmatprep.subr.bf16.mxu0 %v4621_v2  ;;  %v4656_v2 = vld [vmem:[#allocation13 + $0x160] sm:$0xff]  }
 0x322   :  { %3152 = vmatpush2.bf16.msra.mxu0 %v4619_v6  ;;  %v4659_v6 = vld [vmem:[#allocation13 + $0x118] sm:$0xff]  }
 0x323   :  { %4133 = vmatprep.subr.bf16.mxu0 %v4650_v28 }
 0x325   :  { %v2909_v13 = vpop.f32.mrf.mxu0  ;;  %v5105_v23 = vpop.f32.mrf.mxu1  ;;  %3154 = vmatmul.mubr.bf16.vlgmr.msra.gmra.mxu0 %v5075_v40  ;;  %v4654_v40 = vld [vmem:[#allocation13 + $0x168] sm:$0xff]  }
 0x326   :  { %v2910_v20 = vadd.f32 %v2909_v13, %v2869_v12  ;;  %4134 = vmatpush3.bf16.msra.mxu0 %v4651_v29  ;;  %v2951_v50 = vadd.f32 %v5105_v23, %v1285_v48  ;;  %v4662_v12 = vld [vmem:[#allocation13 + $0x148] sm:$0xff]   ;;  %v4664_v23 = vld [vmem:[#allocation13 + $0x140] sm:$0xff]  }
 0x327   :  { %v2911_v21 = vpop.f32.mrf.mxu0  ;;  %v2952_v22 = vpop.f32.mrf.mxu1  ;;  %4135 = vmatprep.subr.bf16.mxu0 %v4652_v19  ;;  %v4663_v13 = vld [vmem:[#allocation13 + $0x108] sm:$0xff]  }
 0x328   :  { %v2912_v25 = vadd.f32 %v2911_v21, %v2871_v27  ;;  %4678 = vtanh.f32 %v2910_v20  ;;  %v2953_v52 = vadd.f32 %v2952_v22, %v1289_v49  ;;  %v4665_v21 = vld [vmem:[#allocation13 + $0x100] sm:$0xff]  }
 0x329   :  { %v2913_v62 = vpop.f32.mrf.mxu0  ;;  %v2954_v24 = vpop.f32.mrf.mxu1 }
 0x32a   :  { %4680 = vtanh.f32 %v2912_v25  ;;  %4136 = vmatpush3.bf16.msra.mxu0 %v4653_v3 }
 0x32b   :  { %v2914_v7 = vpop.f32.mrf.mxu0  ;;  %v2955_v10 = vpop.f32.mrf.mxu1  ;;  %4137 = vmatprep.subr.bf16.mxu0 %v4654_v40  ;;  %v1293_v40 = vrot.slane %v5096_v63, %v5032_v18 }
 0x32e   :  { %4138 = vmatpush3.bf16.msra.mxu0 %v4655_v11  ;;  %v1297_v11 = vrot.slane %v5096_v63, %v5029_v17 }
 0x32f   :  { %4139 = vmatprep.subr.bf16.mxu0 %v4656_v2 }
 0x332   :  { %4140 = vmatpush3.bf16.msra.mxu0 %v4657_v16 }
 0x333   :  { %4141 = vmatprep.subr.bf16.mxu0 %v4658_v15 }
 0x335   :  { %v4679_v30 = vpop.eup %4678 }
 0x336   :  { %v3168_v5 = vpack.c.bf16 %v4679_v30, %v4679_v30  ;;  %4142 = vmatpush3.bf16.msra.mxu0 %v4659_v6 }
 0x337   :  { %v4681_v31 = vpop.eup %4680  ;;  %4143 = vmatprep.subr.bf16.mxu0 %v4660_v8 }
 0x338   :  { %v3169_v32 = vpack.c.bf16 %v4681_v31, %v4681_v31 }
 0x33a   :  { %3597 = vmatprep.mubr.bf16.mxu1 %v3169_v32  ;;  %4144 = vmatpush3.bf16.msra.mxu0 %v4661_v9 }
 0x33b   :  { %3598 = vmatmul.mubr.bf16.vlgmr.msra.gmra.mxu1 %v3168_v5  ;;  %4145 = vmatprep.subr.bf16.mxu0 %v4662_v12 }
 0x33c   :  { %4112 = vmatpush3.bf16.msra.mxu1 %v4635_v33 }
 0x33d   :  { %4113 = vmatprep.subr.bf16.mxu1 %v4636_v34 }
 0x33e   :  { %4146 = vmatpush3.bf16.msra.mxu0 %v4663_v13 }
 0x33f   :  { %4147 = vmatprep.subr.bf16.mxu0 %v4664_v23 }
 0x340   :  { %4114 = vmatpush3.bf16.msra.mxu1 %v4637_v35 }
 0x341   :  { %4115 = vmatprep.subr.bf16.mxu1 %v4638_v36 }
 0x342   :  { %4148 = vmatpush3.bf16.msra.mxu0 %v4665_v21 }
 0x344   :  { %4116 = vmatpush3.bf16.msra.mxu1 %v4639_v37 }
 0x345   :  { %4117 = vmatprep.subr.bf16.mxu1 %v4640_v38 }
 0x348   :  { %4118 = vmatpush3.bf16.msra.mxu1 %v4641_v41 }
 0x349   :  { %4119 = vmatprep.subr.bf16.mxu1 %v4642_v42 }
 0x34c   :  { %4120 = vmatpush3.bf16.msra.mxu1 %v4643_v43 }
 0x34d   :  { %4121 = vmatprep.subr.bf16.mxu1 %v4644_v44 }
 0x350   :  { %4122 = vmatpush3.bf16.msra.mxu1 %v4645_v45 }
 0x351   :  { %4123 = vmatprep.subr.bf16.mxu1 %v4646_v39 }
 0x354   :  { %4124 = vmatpush3.bf16.msra.mxu1 %v4647_v26  ;;  %v4039_v26 = vld [vmem:[#allocation14] ss:$0 sm:$0xff] }
 0x355   :  { %4125 = vmatprep.subr.bf16.mxu1 %v4648_v46 }
 0x358   :  { %4126 = vmatpush3.bf16.msra.mxu1 %v4649_v47 }
 0x365   :  { %v2991_v51 = vpop.f32.mrf.mxu0 }
 0x366   :  { %v2992_v53 = vadd.f32 %v2991_v51, %v2951_v50  ;;  %v3032_v55 = vpop.f32.mrf.mxu1 }
 0x367   :  { %v2993_v56 = vpop.f32.mrf.mxu0 }
 0x368   :  { %v3033_v57 = vadd.f32 %v3032_v55, %v2992_v53  ;;  %v2994_v58 = vadd.f32 %v2993_v56, %v2953_v52  ;;  %v3034_v59 = vpop.f32.mrf.mxu1  ;;  %v3687_v53 = vand.u32 127, %v118_v0  ;;  %v3706_v56 = vpop.permute.xlu0 %3705 }
 0x369   :  { %v2995_v60 = vpop.f32.mrf.mxu0 }
 0x36a   :  { %v3035_v61 = vadd.f32 %v3034_v59, %v2994_v58  ;;  %v3036_v1 = vpop.f32.mrf.mxu1  ;;  %4682 = vtanh.f32 %v3033_v57  ;;  %vm3707_vm4 = vcmp.eq.s32.totalorder %v3687_v53, %v3706_v56  ;;  %vm3688_vm5 = vcmp.lt.s32.totalorder %v3687_v53, 5 }
 0x36b   :  { %v2996_v4 = vpop.f32.mrf.mxu0  ;;  %v4088_v1 = vsel %vm3707_vm4, 1.0, %v4864_v54 }
 0x36c   :  { %4684 = vtanh.f32 %v3035_v61  ;;  %v3037_v14 = vpop.f32.mrf.mxu1 }
 0x377   :  { %v4683_v27 = vpop.eup %4682 }
 0x378   :  { %v3170_v25 = vpack.c.bf16 %v4683_v27, %v4683_v27 }
 0x379   :  { %v4685_v20 = vpop.eup %4684 }
 0x37a   :  { %v3171_v22 = vpack.c.bf16 %v4685_v20, %v4685_v20 }
 0x37c   :  { %3637 = vmatprep.mubr.bf16.mxu1 %v3171_v22 }
 0x37d   :  { %3638 = vmatmul.mubr.bf16.vlgmr.msra.gmra.mxu1 %v3170_v25 }
 0x3a5   :  { %v3073_v62 = vpop.f32.mrf.mxu0 }
 0x3a6   :  { %v3114_v24 = vpop.f32.mrf.mxu1  ;;  %v3074_v30 = vadd.f32 %v3073_v62, %v1293_v40 }
 0x3a7   :  { %v3075_v7 = vpop.f32.mrf.mxu0 }
 0x3a8   :  { %v3116_v10 = vpop.f32.mrf.mxu1  ;;  %v3076_v31 = vadd.f32 %v3075_v7, %v1297_v11  ;;  %v3115_v32 = vadd.f32 %v3114_v24, %v3074_v30 }
 0x3a9   :  { %v3077_v28 = vpop.f32.mrf.mxu0 }
 0x3aa   :  { %v3118_v29 = vpop.f32.mrf.mxu1  ;;  %v3117_v5 = vadd.f32 %v3116_v10, %v3076_v31 }
 0x3ab   :  { %v3078_v19 = vpop.f32.mrf.mxu0 }
 0x3ac   :  { %v3119_v3 = vpop.f32.mrf.mxu1 }
 0x3e5   :  { %v3155_v33 = vpop.f32.mrf.mxu0 }
 0x3e6   :  { %v3156_v34 = vadd.f32 %v3155_v33, %v3115_v32 }
 0x3e7   :  { %v3157_v35 = vpop.f32.mrf.mxu0 }
 0x3e8   :  { %v3158_v36 = vadd.f32 %v3157_v35, %v3117_v5  ;;  %4686 = vtanh.f32 %v3156_v34 }
 0x3e9   :  { %v3159_v37 = vpop.f32.mrf.mxu0 }
 0x3ea   :  { %4688 = vtanh.f32 %v3158_v36 }
 0x3eb   :  { %v3160_v38 = vpop.f32.mrf.mxu0 }
 0x3f5   :  { %v4687_v41 = vpop.eup %4686 }
 0x3f6   :  { %v3172_v44 = vpack.c.bf16 %v4687_v41, %v4687_v41 }
 0x3f7   :  { %v4689_v42 = vpop.eup %4688 }
 0x3f8   :  { %v3173_v43 = vpack.c.bf16 %v4689_v42, %v4689_v42 }
 0x3fa   :  { %3677 = vmatprep.mubr.bf16.mxu0 %v3173_v43 }
 0x3fb   :  { %v4105_v18 = vpop.f32.mrf.mxu1  ;;  %3678 = vmatmul.mubr.bf16.vlgmr.msra.gmra.mxu0 %v3172_v44 }
 0x3fd   :  { %v4106_v17 = vpop.f32.mrf.mxu1 }
 0x3fe   :  { %v4107_v63 = vadd.f32 %v4106_v17, %v4105_v18 }
 0x3ff   :  { %v4108_v45 = vpop.f32.mrf.mxu1 }
 0x400   :  { %v3600_v48 = vadd.f32 %v4107_v63, %v4039_v26 }
 0x401   :  { %v4109_v39 = vpop.f32.mrf.mxu1 }
 0x43d   :  { %v4127_v46 = vpop.f32.mrf.mxu1 }
 0x43f   :  { %v4128_v47 = vpop.f32.mrf.mxu1 }
 0x440   :  { %v4129_v49 = vadd.f32 %v4128_v47, %v4127_v46 }
 0x441   :  { %v4130_v50 = vpop.f32.mrf.mxu1 }
 0x442   :  { %v3640_v51 = vadd.f32 %v4129_v49, %v3600_v48 }
 0x443   :  { %v4131_v52 = vpop.f32.mrf.mxu1 }
 0x4bb   :  { %v4149_v55 = vpop.f32.mrf.mxu0 }
 0x4bd   :  { %v4150_v57 = vpop.f32.mrf.mxu0 }
 0x4be   :  { %v4151_v58 = vadd.f32 %v4150_v57, %v4149_v55 }
 0x4bf   :  { %v4152_v59 = vpop.f32.mrf.mxu0 }
 0x4c0   :  { %v3680_v60 = vadd.f32 %v4151_v58, %v3640_v51 }
 0x4c1   :  { %v4153_v61 = vpop.f32.mrf.mxu0 }
 0x4c2   :  { %3685 = vst [vmem:[#allocation16] sm:$0x3] %v3680_v60  ;;  %v3689_v2 = vsel %vm3688_vm5, %v3680_v60, -1e+30  ;;  %v3710_v16 = vmul.f32 %v4088_v1, %v3680_v60 }
 0x4c3   :  { %v3691_v4 = vsel %vm3690_vm6, %v3689_v2, -inf }
 0x4c4   :  { %3692 = vmax.xlane.f32.xlu1 %v3691_v4  ;;  %v3711_v14 = vsel %vm3690_vm6, %v3710_v16, 0.0 }
 0x4c8   :  { %3712 = vadd.xlane.f32.xlu1 %v3711_v14 }
 0x54d   :  { %v3693_v0 = vpop.xlane.xlu1 %3692 }
 0x54e   :  { %v3694_v15 = vsub.f32 %v3689_v2, %v3693_v0 }
 0x550   :  { %v3695_v6 = vmul.f32 1.442695, %v3694_v15 }
 0x552   :  { %4690 = vpow2.f32 %v3695_v6 }
 0x55f   :  { %v4691_v8 = vpop.eup %4690 }
 0x560   :  { %v3697_v9 = vsel %vm3690_vm6, %v4691_v8, 0.0 }
 0x561   :  { %3698 = vadd.xlane.f32.xlu0 %v3697_v9 }
 0x562   :  { %4833 = shalt.err (!%p4830_p6)
}
 0x563   :  { %3726 = dma.vmem_to_hbm [thread:$0]  %s3724_s25, 32, %s5134_s8, [#allocation7]   ;;  %v3713_v27 = vpop.xlane.xlu1 %3712  ;;  %vm3715_vm7 = vcmask 1024  }
 0x5ea   :  { %v3699_v54 = vpop.xlane.xlu0 %3698 }
 0x5eb   :  { %4692 = vlog2.f32 %v3699_v54 }
 0x5f8   :  { %v4693_v12 = vpop.eup %4692 }
 0x5f9   :  { %v3701_v13 = vmul.f32 0.6931472, %v4693_v12 }
 0x5fb   :  { %v3702_v23 = vadd.f32 %v3701_v13, %v3693_v0 }
 0x5fd   :  { %v3714_v20 = vsub.f32 %v3702_v23, %v3713_v27 }
 0x5ff   :  { %3716 = vst.msk [vmem:[%s5135_s9] sm:$0x3] %vm3715_vm7, %v3714_v20 }
 0x600   :  { %4850 = dma.done.wait [#allocation7], 32  }
 0x601   :  { %4851 = vsyncadd [#allocation7], 4294967264 }
 0x602   :  { %3734 = vsyncpa [#allocation6], 1 }
 0x603   :  { %3735 = vsyncpa [#allocation9], 1 }
 0x604   :  { %3736 = vsyncpa [#allocation12], 1 }
 0x605   :  { %3737 = vsyncpa [#allocation15], 1 }
 0x606   :  { %3738 = vsyncpa [#allocation7], 1 }

</bundles_post_ra>
